<compile_context>
chip_gen: v7x
topology: tpu7x:2x2x1
jax: 0.10.0
libtpu: 0.0.40
codegen_flags: <defaults>
</compile_context>

<pallas_src>
import functools

import numpy as np
import jax
import jax.numpy as jnp
from jax.experimental import pallas as pl
from jax.experimental.pallas import tpu as pltpu

BN_EPS = 1e-5
VMEM_LIMIT = 4 * 1024 * 1024  # actual footprint is well under 1 MiB


# --------------------------------------------------------------------------
# Fused kernel: trunk (conv1x1 + ResBlocks) + linear_common + GRU + heads
# --------------------------------------------------------------------------
def _make_fused_kernel(B, C_lat, HW, Hr, R0, nb, shifts):
    f32 = jnp.float32

    def kernel(x_ref, latf_ref, mask_ref, w1_ref, ncg_ref, ncb_ref,
               rws_ref, rg1_ref, rb1_ref, rg2_ref, rb2_ref,
               lcw_ref, h0_ref, gruw_ref, grub_ref,
               hdw_ref, hdg_ref, hdb_ref, rw1w_ref, rw1b_ref,
               dy1w_ref, dy1g_ref, dy1b_ref,
               nls_ref, h1_ref, rew_ref,
               tap_scr, flat_scr):

        def bn_lanes(y, g, b):
            # training-mode BatchNorm2d: per-channel (=row) stats over the lane axis, f32
            mean = jnp.mean(y, axis=-1, keepdims=True)
            var = jnp.mean(jnp.square(y - mean), axis=-1, keepdims=True)
            return (y - mean) * jax.lax.rsqrt(var + BN_EPS) * g + b

        def bn_batch(y, g, b):
            # training-mode BatchNorm1d: per-feature (=column) stats over the batch axis
            mean = jnp.mean(y, axis=0, keepdims=True)
            var = jnp.mean(jnp.square(y - mean), axis=0, keepdims=True)
            return (y - mean) * jax.lax.rsqrt(var + BN_EPS) * g + b

        masks = mask_ref[...]                       # (9, C_lat, M) - hoisted out of all loops

        def conv3x3(y, w_stack):
            # 3x3 / stride-1 / pad-1 conv as ONE (C, 9C) @ (9C, M) matmul.  Each tap is a
            # static lane roll of the live value (XLU) times a precomputed zero-padding mask
            # (also zeroes batch-crossing / wrapped positions); taps are staged in a VMEM
            # scratch, then consumed by a single MXU pass.
            for t in range(9):
                if shifts[t] == 0:                  # center tap: no shift, mask is all-ones
                    tap = y
                else:
                    tap = pltpu.roll(y, shifts[t], axis=1) * masks[t]
                tap_scr[t * C_lat:(t + 1) * C_lat, :] = tap
            return jnp.dot(w_stack, tap_scr[...], preferred_element_type=f32)

        x = x_ref[...]                              # (C_in, M) channel-rows, lane-dense
        lat_cm = x[:C_lat, :]                       # latent = leading channels

        # conv1x1 -> BN -> (+latent) -> ReLU
        y = jnp.dot(w1_ref[...], x, preferred_element_type=f32)
        y = jnp.maximum(bn_lanes(y, ncg_ref[...], ncb_ref[...]) + lat_cm, 0.0)

        # basic ResBlocks: conv3x3+BN+ReLU, conv3x3+BN, +identity, ReLU
        for blk in range(nb):
            h = jnp.maximum(bn_lanes(conv3x3(y, rws_ref[blk, 0]),
                                     rg1_ref[blk], rb1_ref[blk]), 0.0)
            h = bn_lanes(conv3x3(h, rws_ref[blk, 1]), rg2_ref[blk], rb2_ref[blk])
            y = jnp.maximum(h + y, 0.0)

        # junction: (C_lat, B*HW) channel-rows -> (B, C_lat*HW) NCHW rows via a tiny VMEM
        # scratch (plain ref stores; avoids value-relayout reshapes).
        for b in range(B):
            for c in range(C_lat):
                flat_scr[b:b + 1, c * HW:(c + 1) * HW] = y[c:c + 1, b * HW:(b + 1) * HW]
        x_flat = flat_scr[...]                      # (B, flat) in NCHW flatten order

        # linear_common (bias=False per the module) + ReLU
        gin = jnp.maximum(jnp.dot(x_flat, lcw_ref[...], preferred_element_type=f32), 0.0)

        # GRU step (PyTorch gate order r, z, n) as ONE fused matmul:
        #   [gin | h0] @ [ W_r | W_z | W_n(input) | W_n(hidden) ]  + fused biases
        h0 = h0_ref[...]
        g = jnp.dot(jnp.concatenate([gin, h0], axis=1), gruw_ref[...],
                    preferred_element_type=f32) + grub_ref[...]          # (B, 4*Hr)
        r = jax.nn.sigmoid(g[:, 0:Hr])
        z = jax.nn.sigmoid(g[:, Hr:2 * Hr])
        n = jnp.tanh(g[:, 2 * Hr:3 * Hr] + r * g[:, 3 * Hr:4 * Hr])
        h1 = (1.0 - z) * n + z * h0
        h1_ref[...] = h1

        # reward-head and dynamics-head first Linear+BN+ReLU merged into one matmul + one BN
        hd = jnp.maximum(bn_batch(jnp.dot(h1, hdw_ref[...], preferred_element_type=f32),
                                  hdg_ref[...], hdb_ref[...]), 0.0)      # (B, R0+Hr)
        r1 = hd[:, :R0]
        d1 = hd[:, R0:]

        # reward head tail: Linear (+bias)
        rew_ref[...] = jnp.dot(r1, rw1w_ref[...], preferred_element_type=f32) + rw1b_ref[...]

        # dynamics head tail: Linear -> BN -> ReLU -> (+latent residual), NCHW flatten order
        enc = jnp.maximum(bn_batch(jnp.dot(d1, dy1w_ref[...], preferred_element_type=f32),
                                   dy1g_ref[...], dy1b_ref[...]), 0.0)   # (B, flat)
        nls_ref[...] = enc + latf_ref[...]

    return kernel


# --------------------------------------------------------------------------
# One-time parameter preparation (hoisted out of the per-step forward)
# --------------------------------------------------------------------------
def prepare_params(params, *, action_encoding_dim, H, W, B):
    f32 = jnp.float32
    C_lat, C_in = params['conv_w'].shape[:2]
    assert C_in - action_encoding_dim == C_lat
    HW = H * W
    M = B * HW
    assert H >= 2 and W >= 2  # roll+mask conv scheme derived for 3x3 / stride-1 / pad-1

    def col(v):
        return jnp.asarray(v, f32).reshape(-1, 1)

    def row(v):
        return jnp.asarray(v, f32).reshape(1, -1)

    # conv1x1 (bias=False): (C_lat, C_in, 1, 1) -> (C_lat, C_in)
    w1x1 = jnp.asarray(params['conv_w'], f32).reshape(C_lat, C_in)

    # 3x3 conv weights -> stacked per-tap matmul form (C_out, 9*C_in), tap-major columns
    def stack9(w):
        assert w.shape == (C_lat, C_lat, 3, 3)
        return jnp.asarray(w, f32).transpose(0, 2, 3, 1).reshape(C_lat, 9 * C_lat)

    res_w = jnp.stack([jnp.stack([stack9(b['w1']), stack9(b['w2'])])
                       for b in params['resblocks']])
    res_g1 = jnp.stack([col(b['g1']) for b in params['resblocks']])
    res_b1 = jnp.stack([col(b['b1']) for b in params['resblocks']])
    res_g2 = jnp.stack([col(b['g2']) for b in params['resblocks']])
    res_b2 = jnp.stack([col(b['b2']) for b in params['resblocks']])

    # zero-padding masks for the 9 conv taps, pre-broadcast to (9, C_lat, M) (no in-kernel
    # lane broadcasts).  They also zero every wrapped / batch-crossing rolled position.
    hh, ww = np.meshgrid(np.arange(H), np.arange(W), indexing='ij')
    mask_list = []
    for kh in range(3):
        for kw in range(3):
            dh, dw = kh - 1, kw - 1
            ok = ((hh + dh >= 0) & (hh + dh < H) &
                  (ww + dw >= 0) & (ww + dw < W)).reshape(HW)
            mask_list.append(np.broadcast_to(np.tile(ok, B), (C_lat, M)))
    mask9 = jnp.asarray(np.stack(mask_list).astype(np.float32))

    # linear_common (bias=False); flatten order is NCHW which matches the kernel junction
    lcw = jnp.asarray(params['linear_common_w'], f32).T          # (flat, D)

    # GRU gate weights fused into ONE matmul operand
    wih = jnp.asarray(params['gru_wih'], f32)                    # (3Hr, D)
    whh = jnp.asarray(params['gru_whh'], f32)                    # (3Hr, Hr)
    bih = jnp.asarray(params['gru_bih'], f32)
    bhh = jnp.asarray(params['gru_bhh'], f32)
    Hr = whh.shape[1]
    D = wih.shape[1]
    top = jnp.concatenate([wih[:Hr].T, wih[Hr:2 * Hr].T, wih[2 * Hr:].T,
                           jnp.zeros((D, Hr), f32)], axis=1)     # (D, 4Hr)
    bot = jnp.concatenate([whh[:Hr].T, whh[Hr:2 * Hr].T,
                           jnp.zeros((Hr, Hr), f32), whh[2 * Hr:].T], axis=1)  # (Hr, 4Hr)
    gru_w = jnp.concatenate([top, bot], axis=0)                  # (D+Hr, 4Hr)
    gru_b = jnp.concatenate([bih[:Hr] + bhh[:Hr], bih[Hr:2 * Hr] + bhh[Hr:2 * Hr],
                             bih[2 * Hr:], bhh[2 * Hr:]]).reshape(1, 4 * Hr)

    # reward-head / dynamics-head first Linear + BN merged
    hd_w = jnp.concatenate([jnp.asarray(params['rw0_w'], f32).T,
                            jnp.asarray(params['dy0_w'], f32).T], axis=1)     # (Hr, R0+Hr)
    hd_g = row(jnp.concatenate([jnp.asarray(params['rw0_g'], f32),
                                jnp.asarray(params['dy0_g'], f32)]))
    hd_b = row(jnp.concatenate([jnp.asarray(params['rw0_b'], f32),
                                jnp.asarray(params['dy0_b'], f32)]))

    return dict(
        w1x1=w1x1, nc_g=col(params['nc_g']), nc_b=col(params['nc_b']),
        res_w=res_w, res_g1=res_g1, res_b1=res_b1, res_g2=res_g2, res_b2=res_b2,
        mask9=mask9, lcw=lcw, gru_w=gru_w, gru_b=gru_b,
        hd_w=hd_w, hd_g=hd_g, hd_b=hd_b,
        rw1_w=jnp.asarray(params['rw1_w'], f32).T, rw1_b=row(params['rw1_bias']),
        dy1_w=jnp.asarray(params['dy1_w'], f32).T,
        dy1_g=row(params['dy1_g']), dy1_b=row(params['dy1_b']),
    )


# --------------------------------------------------------------------------
# Per-step forward (only input layout plumbing + one pallas_call)
# --------------------------------------------------------------------------
def dynamics_forward(prepped, state_action_encoding, dynamics_hidden_state, *, action_encoding_dim):
    B, C_in, H, W = state_action_encoding.shape
    C_lat = C_in - action_encoding_dim
    HW = H * W
    M = B * HW
    flat = C_lat * HW
    nb = prepped['res_w'].shape[0]
    Hr = dynamics_hidden_state.shape[-1]
    D = prepped['lcw'].shape[1]
    R0, S = prepped['rw1_w'].shape
    f32 = jnp.float32
    assert prepped['mask9'].shape == (9, C_lat, M)

    sae = state_action_encoding.astype(f32)
    x_cm = sae.transpose(1, 0, 2, 3).reshape(C_in, M)   # channel-rows, lane-dense
    lat_flat = sae[:, :C_lat].reshape(B, flat)          # NCHW flatten order (free reshape)
    h0 = dynamics_hidden_state[0].astype(f32)           # (B, Hr)

    # static lane-roll amounts per tap: roll out[m] = in[(m - shift) % M] = in[m + d]
    shifts = tuple(int((-((kh - 1) * W + (kw - 1))) % M)
                   for kh in range(3) for kw in range(3))

    kernel = _make_fused_kernel(B, C_lat, HW, Hr, R0, nb, shifts)
    vm = pl.BlockSpec(memory_space=pltpu.MemorySpace.VMEM)

    flops = int(2 * M * C_in * C_lat + nb * 2 * (2 * M * 9 * C_lat * C_lat)
                + 2 * B * (flat * D + (D + Hr) * 4 * Hr + Hr * (R0 + Hr) + R0 * S + Hr * flat))
    bytes_accessed = int(4 * (C_in * M + 2 * B * flat + 9 * C_lat * M + C_in * C_lat
                              + nb * 2 * (9 * C_lat * C_lat + 2 * C_lat)
                              + flat * D + B * Hr + (D + Hr) * 4 * Hr + 4 * Hr
                              + Hr * (R0 + Hr) + 2 * (R0 + Hr) + R0 * S + S
                              + Hr * flat + 2 * flat + B * (flat + Hr + S)))
    transcendentals = int(3 * B * Hr)

    nls_flat, h1, reward = pl.pallas_call(
        kernel,
        out_shape=(jax.ShapeDtypeStruct((B, flat), f32),
                   jax.ShapeDtypeStruct((B, Hr), f32),
                   jax.ShapeDtypeStruct((B, S), f32)),
        in_specs=[vm] * 23,
        out_specs=(vm, vm, vm),
        scratch_shapes=[pltpu.VMEM((9 * C_lat, M), f32),   # stacked conv taps
                        pltpu.VMEM((B, flat), f32)],       # trunk->tail junction
        compiler_params=pltpu.CompilerParams(vmem_limit_bytes=VMEM_LIMIT),
        cost_estimate=pl.CostEstimate(flops=flops, transcendentals=transcendentals,
                                      bytes_accessed=bytes_accessed),
    )(x_cm, lat_flat, prepped['mask9'], prepped['w1x1'], prepped['nc_g'], prepped['nc_b'],
      prepped['res_w'], prepped['res_g1'], prepped['res_b1'], prepped['res_g2'], prepped['res_b2'],
      prepped['lcw'], h0, prepped['gru_w'], prepped['gru_b'],
      prepped['hd_w'], prepped['hd_g'], prepped['hd_b'],
      prepped['rw1_w'], prepped['rw1_b'],
      prepped['dy1_w'], prepped['dy1_g'], prepped['dy1_b'])

    next_latent_state = nls_flat.reshape(B, C_lat, H, W)   # NCHW flatten -> free reshape
    return next_latent_state, h1[None], reward


# --------------------------------------------------------------------------
# Pure-JAX reference (for correctness check only)
# --------------------------------------------------------------------------
def reference_forward(params, sae, hid, *, action_encoding_dim):
    B, C_in, H, W = sae.shape
    C_lat = C_in - action_encoding_dim
    latent = sae[:, :C_lat]
    relu = lambda v: jnp.maximum(v, 0.0)

    def conv(x, w, pad):
        return jax.lax.conv_general_dilated(x, w, (1, 1), pad,
                                            dimension_numbers=('NCHW', 'OIHW', 'NCHW'))

    def bn2d(x, g, b):
        mean = jnp.mean(x, axis=(0, 2, 3), keepdims=True)
        var = jnp.mean((x - mean) ** 2, axis=(0, 2, 3), keepdims=True)
        return (x - mean) / jnp.sqrt(var + BN_EPS) * g.reshape(1, -1, 1, 1) + b.reshape(1, -1, 1, 1)

    def bn1d(x, g, b):
        mean = jnp.mean(x, axis=0, keepdims=True)
        var = jnp.mean((x - mean) ** 2, axis=0, keepdims=True)
        return (x - mean) / jnp.sqrt(var + BN_EPS) * g + b

    x = conv(sae, params['conv_w'], 'VALID')
    x = relu(bn2d(x, params['nc_g'], params['nc_b']) + latent)
    for blk in params['resblocks']:
        h1 = relu(bn2d(conv(x, blk['w1'], 'SAME'), blk['g1'], blk['b1']))
        h2 = bn2d(conv(h1, blk['w2'], 'SAME'), blk['g2'], blk['b2'])
        x = relu(h2 + x)
    flat = x.reshape(B, -1)
    gi = relu(flat @ params['linear_common_w'].T)
    h0 = hid[0]
    Hh = h0.shape[1]
    g_i = gi @ params['gru_wih'].T + params['gru_bih']
    g_h = h0 @ params['gru_whh'].T + params['gru_bhh']
    r = jax.nn.sigmoid(g_i[:, :Hh] + g_h[:, :Hh])
    z = jax.nn.sigmoid(g_i[:, Hh:2 * Hh] + g_h[:, Hh:2 * Hh])
    n = jnp.tanh(g_i[:, 2 * Hh:] + r * g_h[:, 2 * Hh:])
    h1s = (1.0 - z) * n + z * h0
    r1 = relu(bn1d(h1s @ params['rw0_w'].T, params['rw0_g'], params['rw0_b']))
    reward = r1 @ params['rw1_w'].T + params['rw1_bias']
    d1 = relu(bn1d(h1s @ params['dy0_w'].T, params['dy0_g'], params['dy0_b']))
    enc = relu(bn1d(d1 @ params['dy1_w'].T, params['dy1_g'], params['dy1_b']))
    nls = enc.reshape(latent.shape) + latent
    return nls, h1s[None], reward


# --------------------------------------------------------------------------
# Deterministic parameter initialization (synthetic, no checkpoint load)
# --------------------------------------------------------------------------
def init_params(key, *, num_channels, action_encoding_dim, H, W, rnn_hidden_size,
                latent_state_dim, reward_hidden, output_support_size, num_res_blocks):
    C_lat = num_channels - action_encoding_dim
    flat_dim = C_lat * H * W
    keys = iter(jax.random.split(key, 64))

    def w(shape, scale=0.2):
        return scale * jax.random.normal(next(keys), shape, jnp.float32)

    def gamma(n):
        return 1.0 + 0.1 * jax.random.normal(next(keys), (n,), jnp.float32)

    def beta(n):
        return 0.1 * jax.random.normal(next(keys), (n,), jnp.float32)

    params = {
        'conv_w': w((C_lat, num_channels, 1, 1)),
        'nc_g': gamma(C_lat), 'nc_b': beta(C_lat),
        'resblocks': [],
        'linear_common_w': w((latent_state_dim, flat_dim), 0.1),
        'gru_wih': w((3 * rnn_hidden_size, latent_state_dim)),
        'gru_whh': w((3 * rnn_hidden_size, rnn_hidden_size)),
        'gru_bih': w((3 * rnn_hidden_size,), 0.1),
        'gru_bhh': w((3 * rnn_hidden_size,), 0.1),
        'rw0_w': w((reward_hidden, rnn_hidden_size)),
        'rw0_g': gamma(reward_hidden), 'rw0_b': beta(reward_hidden),
        # last_linear_layer_init_zero=False chosen so the reward path is non-trivial
        'rw1_w': w((output_support_size, reward_hidden)),
        'rw1_bias': w((output_support_size,), 0.1),
        'dy0_w': w((rnn_hidden_size, rnn_hidden_size)),
        'dy0_g': gamma(rnn_hidden_size), 'dy0_b': beta(rnn_hidden_size),
        'dy1_w': w((flat_dim, rnn_hidden_size)),
        'dy1_g': gamma(flat_dim), 'dy1_b': beta(flat_dim),
    }
    for _ in range(num_res_blocks):
        params['resblocks'].append({
            'w1': w((C_lat, C_lat, 3, 3)), 'g1': gamma(C_lat), 'b1': beta(C_lat),
            'w2': w((C_lat, C_lat, 3, 3)), 'g2': gamma(C_lat), 'b2': beta(C_lat),
        })
    return params


if __name__ == "__main__":
    # Small config consistent with the module: num_channels > action_encoding_dim,
    # latent_state_flatten_dim = C_lat*H*W, GRU input = flatten_input_size_for_reward_head.
    B, num_channels, action_dim, H, W = 2, 6, 2, 8, 8
    rnn_hidden = 32
    latent_state_dim = 16          # flatten_input_size_for_reward_head
    reward_hidden = 32             # reward_head_hidden_channels[0]
    output_support = 21
    num_res_blocks = 1

    key = jax.random.PRNGKey(0)
    kp, kx, kh = jax.random.split(key, 3)
    params = init_params(kp, num_channels=num_channels, action_encoding_dim=action_dim,
                         H=H, W=W, rnn_hidden_size=rnn_hidden,
                         latent_state_dim=latent_state_dim, reward_hidden=reward_hidden,
                         output_support_size=output_support, num_res_blocks=num_res_blocks)

    state_action_encoding = jax.random.normal(kx, (B, num_channels, H, W), jnp.float32)
    dynamics_hidden_state = jax.random.normal(kh, (1, B, rnn_hidden), jnp.float32)

    # one-time weight / mask preparation (hoisted out of the per-step forward)
    prepped = prepare_params(params, action_encoding_dim=action_dim, H=H, W=W, B=B)

    fwd = jax.jit(functools.partial(dynamics_forward, action_encoding_dim=action_dim))
    out = fwd(prepped, state_action_encoding, dynamics_hidden_state)
    next_latent_state, next_hidden, reward = jax.block_until_ready(out)

    # correctness check against a pure-JAX reference of the same math
    ref_nls, ref_hid, ref_rew = reference_forward(params, state_action_encoding,
                                                  dynamics_hidden_state,
                                                  action_encoding_dim=action_dim)
    np.testing.assert_allclose(np.asarray(next_latent_state), np.asarray(ref_nls),
                               rtol=2e-3, atol=2e-3)
    np.testing.assert_allclose(np.asarray(next_hidden), np.asarray(ref_hid),
                               rtol=2e-3, atol=2e-3)
    np.testing.assert_allclose(np.asarray(reward), np.asarray(ref_rew),
                               rtol=2e-3, atol=2e-3)

    assert next_latent_state.shape == (B, num_channels - action_dim, H, W)
    assert next_hidden.shape == (1, B, rnn_hidden)
    assert reward.shape == (B, output_support)
    print("KERNEL_OK")
</pallas_src>

<mosaic_0001>
module attributes {stable_mosaic.version = 11 : i64} {
  func.func @kernel(%arg0: memref<6x128xf32, #tpu.memory_space<vmem>>, %arg1: memref<2x256xf32, #tpu.memory_space<vmem>>, %arg2: memref<9x4x128xf32, #tpu.memory_space<vmem>>, %arg3: memref<4x6xf32, #tpu.memory_space<vmem>>, %arg4: memref<4x1xf32, #tpu.memory_space<vmem>>, %arg5: memref<4x1xf32, #tpu.memory_space<vmem>>, %arg6: memref<1x2x4x36xf32, #tpu.memory_space<vmem>>, %arg7: memref<1x4x1xf32, #tpu.memory_space<vmem>>, %arg8: memref<1x4x1xf32, #tpu.memory_space<vmem>>, %arg9: memref<1x4x1xf32, #tpu.memory_space<vmem>>, %arg10: memref<1x4x1xf32, #tpu.memory_space<vmem>>, %arg11: memref<256x16xf32, #tpu.memory_space<vmem>>, %arg12: memref<2x32xf32, #tpu.memory_space<vmem>>, %arg13: memref<48x128xf32, #tpu.memory_space<vmem>>, %arg14: memref<1x128xf32, #tpu.memory_space<vmem>>, %arg15: memref<32x64xf32, #tpu.memory_space<vmem>>, %arg16: memref<1x64xf32, #tpu.memory_space<vmem>>, %arg17: memref<1x64xf32, #tpu.memory_space<vmem>>, %arg18: memref<32x21xf32, #tpu.memory_space<vmem>>, %arg19: memref<1x21xf32, #tpu.memory_space<vmem>>, %arg20: memref<32x256xf32, #tpu.memory_space<vmem>>, %arg21: memref<1x256xf32, #tpu.memory_space<vmem>>, %arg22: memref<1x256xf32, #tpu.memory_space<vmem>>, %arg23: memref<2x256xf32, #tpu.memory_space<vmem>>, %arg24: memref<2x32xf32, #tpu.memory_space<vmem>>, %arg25: memref<2x21xf32, #tpu.memory_space<vmem>>, %arg26: memref<36x128xf32, #tpu.memory_space<vmem>>, %arg27: memref<2x256xf32, #tpu.memory_space<vmem>>) attributes {dimension_semantics = [], scalar_prefetch = 0 : i64, scratch_operands = 2 : i64, tpu.core_type = #tpu.core_type<tc>} {
    %c0 = arith.constant 0 : index
    %c0_0 = arith.constant 0 : index
    %c0_1 = arith.constant 0 : index
    %0 = vector.load %arg2[%c0, %c0_0, %c0_1] : memref<9x4x128xf32, #tpu.memory_space<vmem>>, vector<9x4x128xf32>
    %c0_2 = arith.constant 0 : index
    %c0_3 = arith.constant 0 : index
    %1 = vector.load %arg0[%c0_2, %c0_3] : memref<6x128xf32, #tpu.memory_space<vmem>>, vector<6x128xf32>
    %2 = vector.extract_strided_slice %1 {offsets = [0, 0], sizes = [4, 128], strides = [1, 1]} : vector<6x128xf32> to vector<4x128xf32>
    %c0_4 = arith.constant 0 : index
    %c0_5 = arith.constant 0 : index
    %3 = vector.load %arg3[%c0_4, %c0_5] : memref<4x6xf32, #tpu.memory_space<vmem>>, vector<4x6xf32>
    %cst = arith.constant dense<0.000000e+00> : vector<4x128xf32>
    %4 = tpu.matmul %3, %1, %cst {dimension_numbers = #tpu.dot_dimension_numbers<[1], [0], [0], [1], [0, 0, 1, 1], [], []>} : vector<4x6xf32>, vector<6x128xf32>, vector<4x128xf32> -> vector<4x128xf32>
    %c0_6 = arith.constant 0 : index
    %c0_7 = arith.constant 0 : index
    %5 = vector.load %arg4[%c0_6, %c0_7] : memref<4x1xf32, #tpu.memory_space<vmem>>, vector<4x1xf32>
    %c0_8 = arith.constant 0 : index
    %c0_9 = arith.constant 0 : index
    %6 = vector.load %arg5[%c0_8, %c0_9] : memref<4x1xf32, #tpu.memory_space<vmem>>, vector<4x1xf32>
    %cst_10 = arith.constant dense<0.000000e+00> : vector<4xf32>
    %7 = vector.multi_reduction <add>, %4, %cst_10 [1] : vector<4x128xf32> to vector<4xf32>
    %8 = vector.shape_cast %7 : vector<4xf32> to vector<4x1xf32>
    %cst_11 = arith.constant 1.280000e+02 : f32
    %9 = vector.broadcast %cst_11 : f32 to vector<4x1xf32>
    %10 = arith.divf %8, %9 : vector<4x1xf32>
    %11 = vector.broadcast %10 : vector<4x1xf32> to vector<4x128xf32>
    %12 = arith.subf %4, %11 : vector<4x128xf32>
    %13 = arith.mulf %12, %12 : vector<4x128xf32>
    %cst_12 = arith.constant dense<0.000000e+00> : vector<4xf32>
    %14 = vector.multi_reduction <add>, %13, %cst_12 [1] : vector<4x128xf32> to vector<4xf32>
    %15 = vector.shape_cast %14 : vector<4xf32> to vector<4x1xf32>
    %cst_13 = arith.constant 1.280000e+02 : f32
    %16 = vector.broadcast %cst_13 : f32 to vector<4x1xf32>
    %17 = arith.divf %15, %16 : vector<4x1xf32>
    %18 = vector.broadcast %10 : vector<4x1xf32> to vector<4x128xf32>
    %19 = arith.subf %4, %18 : vector<4x128xf32>
    %cst_14 = arith.constant 9.99999974E-6 : f32
    %20 = vector.broadcast %cst_14 : f32 to vector<4x1xf32>
    %21 = arith.addf %17, %20 : vector<4x1xf32>
    %22 = math.rsqrt %21 : vector<4x1xf32>
    %23 = vector.broadcast %22 : vector<4x1xf32> to vector<4x128xf32>
    %24 = arith.mulf %19, %23 : vector<4x128xf32>
    %25 = vector.broadcast %5 : vector<4x1xf32> to vector<4x128xf32>
    %26 = arith.mulf %24, %25 : vector<4x128xf32>
    %27 = vector.broadcast %6 : vector<4x1xf32> to vector<4x128xf32>
    %28 = arith.addf %26, %27 : vector<4x128xf32>
    %29 = arith.addf %28, %2 : vector<4x128xf32>
    %cst_15 = arith.constant 0.000000e+00 : f32
    %30 = vector.broadcast %cst_15 : f32 to vector<4x128xf32>
    %31 = arith.maximumf %29, %30 : vector<4x128xf32>
    %c0_16 = arith.constant 0 : index
    %c0_17 = arith.constant 0 : index
    %c0_18 = arith.constant 0 : index
    %c0_19 = arith.constant 0 : index
    %32 = vector.load %arg6[%c0_16, %c0_17, %c0_18, %c0_19] : memref<1x2x4x36xf32, #tpu.memory_space<vmem>>, vector<1x1x4x36xf32>
    %33 = vector.shape_cast %32 : vector<1x1x4x36xf32> to vector<4x36xf32>
    %c9_i32 = arith.constant 9 : i32
    %34 = tpu.dynamic_rotate %31 by %c9_i32 dim 1 : vector<4x128xf32>, i32 -> vector<4x128xf32>
    %35 = vector.extract_strided_slice %0 {offsets = [0, 0, 0], sizes = [1, 4, 128], strides = [1, 1, 1]} : vector<9x4x128xf32> to vector<1x4x128xf32>
    %36 = vector.shape_cast %35 : vector<1x4x128xf32> to vector<4x128xf32>
    %37 = arith.mulf %34, %36 : vector<4x128xf32>
    %c0_20 = arith.constant 0 : index
    %c0_21 = arith.constant 0 : index
    %38 = vector.load %arg26[%c0_20, %c0_21] : memref<36x128xf32, #tpu.memory_space<vmem>>, vector<4x128xf32>
    tpu.vector_store %arg26[%c0_20, %c0_21], %37 {strides = array<i32>} : memref<36x128xf32, #tpu.memory_space<vmem>>, vector<4x128xf32>,
    %c8_i32 = arith.constant 8 : i32
    %39 = tpu.dynamic_rotate %31 by %c8_i32 dim 1 : vector<4x128xf32>, i32 -> vector<4x128xf32>
    %40 = vector.extract_strided_slice %0 {offsets = [1, 0, 0], sizes = [1, 4, 128], strides = [1, 1, 1]} : vector<9x4x128xf32> to vector<1x4x128xf32>
    %41 = vector.shape_cast %40 : vector<1x4x128xf32> to vector<4x128xf32>
    %42 = arith.mulf %39, %41 : vector<4x128xf32>
    %c4 = arith.constant 4 : index
    %c0_22 = arith.constant 0 : index
    %43 = vector.load %arg26[%c4, %c0_22] : memref<36x128xf32, #tpu.memory_space<vmem>>, vector<4x128xf32>
    tpu.vector_store %arg26[%c4, %c0_22], %42 {strides = array<i32>} : memref<36x128xf32, #tpu.memory_space<vmem>>, vector<4x128xf32>,
    %c7_i32 = arith.constant 7 : i32
    %44 = tpu.dynamic_rotate %31 by %c7_i32 dim 1 : vector<4x128xf32>, i32 -> vector<4x128xf32>
    %45 = vector.extract_strided_slice %0 {offsets = [2, 0, 0], sizes = [1, 4, 128], strides = [1, 1, 1]} : vector<9x4x128xf32> to vector<1x4x128xf32>
    %46 = vector.shape_cast %45 : vector<1x4x128xf32> to vector<4x128xf32>
    %47 = arith.mulf %44, %46 : vector<4x128xf32>
    %c8 = arith.constant 8 : index
    %c0_23 = arith.constant 0 : index
    %48 = vector.load %arg26[%c8, %c0_23] : memref<36x128xf32, #tpu.memory_space<vmem>>, vector<4x128xf32>
    tpu.vector_store %arg26[%c8, %c0_23], %47 {strides = array<i32>} : memref<36x128xf32, #tpu.memory_space<vmem>>, vector<4x128xf32>,
    %c1_i32 = arith.constant 1 : i32
    %49 = tpu.dynamic_rotate %31 by %c1_i32 dim 1 : vector<4x128xf32>, i32 -> vector<4x128xf32>
    %50 = vector.extract_strided_slice %0 {offsets = [3, 0, 0], sizes = [1, 4, 128], strides = [1, 1, 1]} : vector<9x4x128xf32> to vector<1x4x128xf32>
    %51 = vector.shape_cast %50 : vector<1x4x128xf32> to vector<4x128xf32>
    %52 = arith.mulf %49, %51 : vector<4x128xf32>
    %c12 = arith.constant 12 : index
    %c0_24 = arith.constant 0 : index
    %53 = vector.load %arg26[%c12, %c0_24] : memref<36x128xf32, #tpu.memory_space<vmem>>, vector<4x128xf32>
    tpu.vector_store %arg26[%c12, %c0_24], %52 {strides = array<i32>} : memref<36x128xf32, #tpu.memory_space<vmem>>, vector<4x128xf32>,
    %c16 = arith.constant 16 : index
    %c0_25 = arith.constant 0 : index
    %54 = vector.load %arg26[%c16, %c0_25] : memref<36x128xf32, #tpu.memory_space<vmem>>, vector<4x128xf32>
    tpu.vector_store %arg26[%c16, %c0_25], %31 {strides = array<i32>} : memref<36x128xf32, #tpu.memory_space<vmem>>, vector<4x128xf32>,
    %c127_i32 = arith.constant 127 : i32
    %55 = tpu.dynamic_rotate %31 by %c127_i32 dim 1 : vector<4x128xf32>, i32 -> vector<4x128xf32>
    %56 = vector.extract_strided_slice %0 {offsets = [5, 0, 0], sizes = [1, 4, 128], strides = [1, 1, 1]} : vector<9x4x128xf32> to vector<1x4x128xf32>
    %57 = vector.shape_cast %56 : vector<1x4x128xf32> to vector<4x128xf32>
    %58 = arith.mulf %55, %57 : vector<4x128xf32>
    %c20 = arith.constant 20 : index
    %c0_26 = arith.constant 0 : index
    %59 = vector.load %arg26[%c20, %c0_26] : memref<36x128xf32, #tpu.memory_space<vmem>>, vector<4x128xf32>
    tpu.vector_store %arg26[%c20, %c0_26], %58 {strides = array<i32>} : memref<36x128xf32, #tpu.memory_space<vmem>>, vector<4x128xf32>,
    %c121_i32 = arith.constant 121 : i32
    %60 = tpu.dynamic_rotate %31 by %c121_i32 dim 1 : vector<4x128xf32>, i32 -> vector<4x128xf32>
    %61 = vector.extract_strided_slice %0 {offsets = [6, 0, 0], sizes = [1, 4, 128], strides = [1, 1, 1]} : vector<9x4x128xf32> to vector<1x4x128xf32>
    %62 = vector.shape_cast %61 : vector<1x4x128xf32> to vector<4x128xf32>
    %63 = arith.mulf %60, %62 : vector<4x128xf32>
    %c24 = arith.constant 24 : index
    %c0_27 = arith.constant 0 : index
    %64 = vector.load %arg26[%c24, %c0_27] : memref<36x128xf32, #tpu.memory_space<vmem>>, vector<4x128xf32>
    tpu.vector_store %arg26[%c24, %c0_27], %63 {strides = array<i32>} : memref<36x128xf32, #tpu.memory_space<vmem>>, vector<4x128xf32>,
    %c120_i32 = arith.constant 120 : i32
    %65 = tpu.dynamic_rotate %31 by %c120_i32 dim 1 : vector<4x128xf32>, i32 -> vector<4x128xf32>
    %66 = vector.extract_strided_slice %0 {offsets = [7, 0, 0], sizes = [1, 4, 128], strides = [1, 1, 1]} : vector<9x4x128xf32> to vector<1x4x128xf32>
    %67 = vector.shape_cast %66 : vector<1x4x128xf32> to vector<4x128xf32>
    %68 = arith.mulf %65, %67 : vector<4x128xf32>
    %c28 = arith.constant 28 : index
    %c0_28 = arith.constant 0 : index
    %69 = vector.load %arg26[%c28, %c0_28] : memref<36x128xf32, #tpu.memory_space<vmem>>, vector<4x128xf32>
    tpu.vector_store %arg26[%c28, %c0_28], %68 {strides = array<i32>} : memref<36x128xf32, #tpu.memory_space<vmem>>, vector<4x128xf32>,
    %c119_i32 = arith.constant 119 : i32
    %70 = tpu.dynamic_rotate %31 by %c119_i32 dim 1 : vector<4x128xf32>, i32 -> vector<4x128xf32>
    %71 = vector.extract_strided_slice %0 {offsets = [8, 0, 0], sizes = [1, 4, 128], strides = [1, 1, 1]} : vector<9x4x128xf32> to vector<1x4x128xf32>
    %72 = vector.shape_cast %71 : vector<1x4x128xf32> to vector<4x128xf32>
    %73 = arith.mulf %70, %72 : vector<4x128xf32>
    %c32 = arith.constant 32 : index
    %c0_29 = arith.constant 0 : index
    %74 = vector.load %arg26[%c32, %c0_29] : memref<36x128xf32, #tpu.memory_space<vmem>>, vector<4x128xf32>
    tpu.vector_store %arg26[%c32, %c0_29], %73 {strides = array<i32>} : memref<36x128xf32, #tpu.memory_space<vmem>>, vector<4x128xf32>,
    %c0_30 = arith.constant 0 : index
    %c0_31 = arith.constant 0 : index
    %75 = vector.load %arg26[%c0_30, %c0_31] : memref<36x128xf32, #tpu.memory_space<vmem>>, vector<36x128xf32>
    %cst_32 = arith.constant dense<0.000000e+00> : vector<4x128xf32>
    %76 = tpu.matmul %33, %75, %cst_32 {dimension_numbers = #tpu.dot_dimension_numbers<[1], [0], [0], [1], [0, 0, 1, 1], [], []>} : vector<4x36xf32>, vector<36x128xf32>, vector<4x128xf32> -> vector<4x128xf32>
    %c0_33 = arith.constant 0 : index
    %c0_34 = arith.constant 0 : index
    %c0_35 = arith.constant 0 : index
    %77 = vector.load %arg7[%c0_33, %c0_34, %c0_35] : memref<1x4x1xf32, #tpu.memory_space<vmem>>, vector<1x4x1xf32>
    %78 = vector.shape_cast %77 : vector<1x4x1xf32> to vector<4x1xf32>
    %c0_36 = arith.constant 0 : index
    %c0_37 = arith.constant 0 : index
    %c0_38 = arith.constant 0 : index
    %79 = vector.load %arg8[%c0_36, %c0_37, %c0_38] : memref<1x4x1xf32, #tpu.memory_space<vmem>>, vector<1x4x1xf32>
    %80 = vector.shape_cast %79 : vector<1x4x1xf32> to vector<4x1xf32>
    %cst_39 = arith.constant dense<0.000000e+00> : vector<4xf32>
    %81 = vector.multi_reduction <add>, %76, %cst_39 [1] : vector<4x128xf32> to vector<4xf32>
    %82 = vector.shape_cast %81 : vector<4xf32> to vector<4x1xf32>
    %cst_40 = arith.constant 1.280000e+02 : f32
    %83 = vector.broadcast %cst_40 : f32 to vector<4x1xf32>
    %84 = arith.divf %82, %83 : vector<4x1xf32>
    %85 = vector.broadcast %84 : vector<4x1xf32> to vector<4x128xf32>
    %86 = arith.subf %76, %85 : vector<4x128xf32>
    %87 = arith.mulf %86, %86 : vector<4x128xf32>
    %cst_41 = arith.constant dense<0.000000e+00> : vector<4xf32>
    %88 = vector.multi_reduction <add>, %87, %cst_41 [1] : vector<4x128xf32> to vector<4xf32>
    %89 = vector.shape_cast %88 : vector<4xf32> to vector<4x1xf32>
    %cst_42 = arith.constant 1.280000e+02 : f32
    %90 = vector.broadcast %cst_42 : f32 to vector<4x1xf32>
    %91 = arith.divf %89, %90 : vector<4x1xf32>
    %92 = vector.broadcast %84 : vector<4x1xf32> to vector<4x128xf32>
    %93 = arith.subf %76, %92 : vector<4x128xf32>
    %cst_43 = arith.constant 9.99999974E-6 : f32
    %94 = vector.broadcast %cst_43 : f32 to vector<4x1xf32>
    %95 = arith.addf %91, %94 : vector<4x1xf32>
    %96 = math.rsqrt %95 : vector<4x1xf32>
    %97 = vector.broadcast %96 : vector<4x1xf32> to vector<4x128xf32>
    %98 = arith.mulf %93, %97 : vector<4x128xf32>
    %99 = vector.broadcast %78 : vector<4x1xf32> to vector<4x128xf32>
    %100 = arith.mulf %98, %99 : vector<4x128xf32>
    %101 = vector.broadcast %80 : vector<4x1xf32> to vector<4x128xf32>
    %102 = arith.addf %100, %101 : vector<4x128xf32>
    %cst_44 = arith.constant 0.000000e+00 : f32
    %103 = vector.broadcast %cst_44 : f32 to vector<4x128xf32>
    %104 = arith.maximumf %102, %103 : vector<4x128xf32>
    %c0_45 = arith.constant 0 : index
    %c1 = arith.constant 1 : index
    %c0_46 = arith.constant 0 : index
    %c0_47 = arith.constant 0 : index
    %105 = vector.load %arg6[%c0_45, %c1, %c0_46, %c0_47] : memref<1x2x4x36xf32, #tpu.memory_space<vmem>>, vector<1x1x4x36xf32>
    %106 = vector.shape_cast %105 : vector<1x1x4x36xf32> to vector<4x36xf32>
    %c9_i32_48 = arith.constant 9 : i32
    %107 = tpu.dynamic_rotate %104 by %c9_i32_48 dim 1 : vector<4x128xf32>, i32 -> vector<4x128xf32>
    %108 = vector.extract_strided_slice %0 {offsets = [0, 0, 0], sizes = [1, 4, 128], strides = [1, 1, 1]} : vector<9x4x128xf32> to vector<1x4x128xf32>
    %109 = vector.shape_cast %108 : vector<1x4x128xf32> to vector<4x128xf32>
    %110 = arith.mulf %107, %109 : vector<4x128xf32>
    %c0_49 = arith.constant 0 : index
    %c0_50 = arith.constant 0 : index
    %111 = vector.load %arg26[%c0_49, %c0_50] : memref<36x128xf32, #tpu.memory_space<vmem>>, vector<4x128xf32>
    tpu.vector_store %arg26[%c0_49, %c0_50], %110 {strides = array<i32>} : memref<36x128xf32, #tpu.memory_space<vmem>>, vector<4x128xf32>,
    %c8_i32_51 = arith.constant 8 : i32
    %112 = tpu.dynamic_rotate %104 by %c8_i32_51 dim 1 : vector<4x128xf32>, i32 -> vector<4x128xf32>
    %113 = vector.extract_strided_slice %0 {offsets = [1, 0, 0], sizes = [1, 4, 128], strides = [1, 1, 1]} : vector<9x4x128xf32> to vector<1x4x128xf32>
    %114 = vector.shape_cast %113 : vector<1x4x128xf32> to vector<4x128xf32>
    %115 = arith.mulf %112, %114 : vector<4x128xf32>
    %c4_52 = arith.constant 4 : index
    %c0_53 = arith.constant 0 : index
    %116 = vector.load %arg26[%c4_52, %c0_53] : memref<36x128xf32, #tpu.memory_space<vmem>>, vector<4x128xf32>
    tpu.vector_store %arg26[%c4_52, %c0_53], %115 {strides = array<i32>} : memref<36x128xf32, #tpu.memory_space<vmem>>, vector<4x128xf32>,
    %c7_i32_54 = arith.constant 7 : i32
    %117 = tpu.dynamic_rotate %104 by %c7_i32_54 dim 1 : vector<4x128xf32>, i32 -> vector<4x128xf32>
    %118 = vector.extract_strided_slice %0 {offsets = [2, 0, 0], sizes = [1, 4, 128], strides = [1, 1, 1]} : vector<9x4x128xf32> to vector<1x4x128xf32>
    %119 = vector.shape_cast %118 : vector<1x4x128xf32> to vector<4x128xf32>
    %120 = arith.mulf %117, %119 : vector<4x128xf32>
    %c8_55 = arith.constant 8 : index
    %c0_56 = arith.constant 0 : index
    %121 = vector.load %arg26[%c8_55, %c0_56] : memref<36x128xf32, #tpu.memory_space<vmem>>, vector<4x128xf32>
    tpu.vector_store %arg26[%c8_55, %c0_56], %120 {strides = array<i32>} : memref<36x128xf32, #tpu.memory_space<vmem>>, vector<4x128xf32>,
    %c1_i32_57 = arith.constant 1 : i32
    %122 = tpu.dynamic_rotate %104 by %c1_i32_57 dim 1 : vector<4x128xf32>, i32 -> vector<4x128xf32>
    %123 = vector.extract_strided_slice %0 {offsets = [3, 0, 0], sizes = [1, 4, 128], strides = [1, 1, 1]} : vector<9x4x128xf32> to vector<1x4x128xf32>
    %124 = vector.shape_cast %123 : vector<1x4x128xf32> to vector<4x128xf32>
    %125 = arith.mulf %122, %124 : vector<4x128xf32>
    %c12_58 = arith.constant 12 : index
    %c0_59 = arith.constant 0 : index
    %126 = vector.load %arg26[%c12_58, %c0_59] : memref<36x128xf32, #tpu.memory_space<vmem>>, vector<4x128xf32>
    tpu.vector_store %arg26[%c12_58, %c0_59], %125 {strides = array<i32>} : memref<36x128xf32, #tpu.memory_space<vmem>>, vector<4x128xf32>,
    %c16_60 = arith.constant 16 : index
    %c0_61 = arith.constant 0 : index
    %127 = vector.load %arg26[%c16_60, %c0_61] : memref<36x128xf32, #tpu.memory_space<vmem>>, vector<4x128xf32>
    tpu.vector_store %arg26[%c16_60, %c0_61], %104 {strides = array<i32>} : memref<36x128xf32, #tpu.memory_space<vmem>>, vector<4x128xf32>,
    %c127_i32_62 = arith.constant 127 : i32
    %128 = tpu.dynamic_rotate %104 by %c127_i32_62 dim 1 : vector<4x128xf32>, i32 -> vector<4x128xf32>
    %129 = vector.extract_strided_slice %0 {offsets = [5, 0, 0], sizes = [1, 4, 128], strides = [1, 1, 1]} : vector<9x4x128xf32> to vector<1x4x128xf32>
    %130 = vector.shape_cast %129 : vector<1x4x128xf32> to vector<4x128xf32>
    %131 = arith.mulf %128, %130 : vector<4x128xf32>
    %c20_63 = arith.constant 20 : index
    %c0_64 = arith.constant 0 : index
    %132 = vector.load %arg26[%c20_63, %c0_64] : memref<36x128xf32, #tpu.memory_space<vmem>>, vector<4x128xf32>
    tpu.vector_store %arg26[%c20_63, %c0_64], %131 {strides = array<i32>} : memref<36x128xf32, #tpu.memory_space<vmem>>, vector<4x128xf32>,
    %c121_i32_65 = arith.constant 121 : i32
    %133 = tpu.dynamic_rotate %104 by %c121_i32_65 dim 1 : vector<4x128xf32>, i32 -> vector<4x128xf32>
    %134 = vector.extract_strided_slice %0 {offsets = [6, 0, 0], sizes = [1, 4, 128], strides = [1, 1, 1]} : vector<9x4x128xf32> to vector<1x4x128xf32>
    %135 = vector.shape_cast %134 : vector<1x4x128xf32> to vector<4x128xf32>
    %136 = arith.mulf %133, %135 : vector<4x128xf32>
    %c24_66 = arith.constant 24 : index
    %c0_67 = arith.constant 0 : index
    %137 = vector.load %arg26[%c24_66, %c0_67] : memref<36x128xf32, #tpu.memory_space<vmem>>, vector<4x128xf32>
    tpu.vector_store %arg26[%c24_66, %c0_67], %136 {strides = array<i32>} : memref<36x128xf32, #tpu.memory_space<vmem>>, vector<4x128xf32>,
    %c120_i32_68 = arith.constant 120 : i32
    %138 = tpu.dynamic_rotate %104 by %c120_i32_68 dim 1 : vector<4x128xf32>, i32 -> vector<4x128xf32>
    %139 = vector.extract_strided_slice %0 {offsets = [7, 0, 0], sizes = [1, 4, 128], strides = [1, 1, 1]} : vector<9x4x128xf32> to vector<1x4x128xf32>
    %140 = vector.shape_cast %139 : vector<1x4x128xf32> to vector<4x128xf32>
    %141 = arith.mulf %138, %140 : vector<4x128xf32>
    %c28_69 = arith.constant 28 : index
    %c0_70 = arith.constant 0 : index
    %142 = vector.load %arg26[%c28_69, %c0_70] : memref<36x128xf32, #tpu.memory_space<vmem>>, vector<4x128xf32>
    tpu.vector_store %arg26[%c28_69, %c0_70], %141 {strides = array<i32>} : memref<36x128xf32, #tpu.memory_space<vmem>>, vector<4x128xf32>,
    %c119_i32_71 = arith.constant 119 : i32
    %143 = tpu.dynamic_rotate %104 by %c119_i32_71 dim 1 : vector<4x128xf32>, i32 -> vector<4x128xf32>
    %144 = vector.extract_strided_slice %0 {offsets = [8, 0, 0], sizes = [1, 4, 128], strides = [1, 1, 1]} : vector<9x4x128xf32> to vector<1x4x128xf32>
    %145 = vector.shape_cast %144 : vector<1x4x128xf32> to vector<4x128xf32>
    %146 = arith.mulf %143, %145 : vector<4x128xf32>
    %c32_72 = arith.constant 32 : index
    %c0_73 = arith.constant 0 : index
    %147 = vector.load %arg26[%c32_72, %c0_73] : memref<36x128xf32, #tpu.memory_space<vmem>>, vector<4x128xf32>
    tpu.vector_store %arg26[%c32_72, %c0_73], %146 {strides = array<i32>} : memref<36x128xf32, #tpu.memory_space<vmem>>, vector<4x128xf32>,
    %c0_74 = arith.constant 0 : index
    %c0_75 = arith.constant 0 : index
    %148 = vector.load %arg26[%c0_74, %c0_75] : memref<36x128xf32, #tpu.memory_space<vmem>>, vector<36x128xf32>
    %cst_76 = arith.constant dense<0.000000e+00> : vector<4x128xf32>
    %149 = tpu.matmul %106, %148, %cst_76 {dimension_numbers = #tpu.dot_dimension_numbers<[1], [0], [0], [1], [0, 0, 1, 1], [], []>} : vector<4x36xf32>, vector<36x128xf32>, vector<4x128xf32> -> vector<4x128xf32>
    %c0_77 = arith.constant 0 : index
    %c0_78 = arith.constant 0 : index
    %c0_79 = arith.constant 0 : index
    %150 = vector.load %arg9[%c0_77, %c0_78, %c0_79] : memref<1x4x1xf32, #tpu.memory_space<vmem>>, vector<1x4x1xf32>
    %151 = vector.shape_cast %150 : vector<1x4x1xf32> to vector<4x1xf32>
    %c0_80 = arith.constant 0 : index
    %c0_81 = arith.constant 0 : index
    %c0_82 = arith.constant 0 : index
    %152 = vector.load %arg10[%c0_80, %c0_81, %c0_82] : memref<1x4x1xf32, #tpu.memory_space<vmem>>, vector<1x4x1xf32>
    %153 = vector.shape_cast %152 : vector<1x4x1xf32> to vector<4x1xf32>
    %cst_83 = arith.constant dense<0.000000e+00> : vector<4xf32>
    %154 = vector.multi_reduction <add>, %149, %cst_83 [1] : vector<4x128xf32> to vector<4xf32>
    %155 = vector.shape_cast %154 : vector<4xf32> to vector<4x1xf32>
    %cst_84 = arith.constant 1.280000e+02 : f32
    %156 = vector.broadcast %cst_84 : f32 to vector<4x1xf32>
    %157 = arith.divf %155, %156 : vector<4x1xf32>
    %158 = vector.broadcast %157 : vector<4x1xf32> to vector<4x128xf32>
    %159 = arith.subf %149, %158 : vector<4x128xf32>
    %160 = arith.mulf %159, %159 : vector<4x128xf32>
    %cst_85 = arith.constant dense<0.000000e+00> : vector<4xf32>
    %161 = vector.multi_reduction <add>, %160, %cst_85 [1] : vector<4x128xf32> to vector<4xf32>
    %162 = vector.shape_cast %161 : vector<4xf32> to vector<4x1xf32>
    %cst_86 = arith.constant 1.280000e+02 : f32
    %163 = vector.broadcast %cst_86 : f32 to vector<4x1xf32>
    %164 = arith.divf %162, %163 : vector<4x1xf32>
    %165 = vector.broadcast %157 : vector<4x1xf32> to vector<4x128xf32>
    %166 = arith.subf %149, %165 : vector<4x128xf32>
    %cst_87 = arith.constant 9.99999974E-6 : f32
    %167 = vector.broadcast %cst_87 : f32 to vector<4x1xf32>
    %168 = arith.addf %164, %167 : vector<4x1xf32>
    %169 = math.rsqrt %168 : vector<4x1xf32>
    %170 = vector.broadcast %169 : vector<4x1xf32> to vector<4x128xf32>
    %171 = arith.mulf %166, %170 : vector<4x128xf32>
    %172 = vector.broadcast %151 : vector<4x1xf32> to vector<4x128xf32>
    %173 = arith.mulf %171, %172 : vector<4x128xf32>
    %174 = vector.broadcast %153 : vector<4x1xf32> to vector<4x128xf32>
    %175 = arith.addf %173, %174 : vector<4x128xf32>
    %176 = arith.addf %175, %31 : vector<4x128xf32>
    %cst_88 = arith.constant 0.000000e+00 : f32
    %177 = vector.broadcast %cst_88 : f32 to vector<4x128xf32>
    %178 = arith.maximumf %176, %177 : vector<4x128xf32>
    %179 = vector.extract_strided_slice %178 {offsets = [0, 0], sizes = [1, 64], strides = [1, 1]} : vector<4x128xf32> to vector<1x64xf32>
    %c0_89 = arith.constant 0 : index
    %c0_90 = arith.constant 0 : index
    %180 = vector.load %arg27[%c0_89, %c0_90] : memref<2x256xf32, #tpu.memory_space<vmem>>, vector<1x64xf32>
    tpu.vector_store %arg27[%c0_89, %c0_90], %179 {strides = array<i32>} : memref<2x256xf32, #tpu.memory_space<vmem>>, vector<1x64xf32>,
    %181 = vector.extract_strided_slice %178 {offsets = [1, 0], sizes = [1, 64], strides = [1, 1]} : vector<4x128xf32> to vector<1x64xf32>
    %c0_91 = arith.constant 0 : index
    %c64 = arith.constant 64 : index
    %182 = vector.load %arg27[%c0_91, %c64] : memref<2x256xf32, #tpu.memory_space<vmem>>, vector<1x64xf32>
    tpu.vector_store %arg27[%c0_91, %c64], %181 {strides = array<i32>} : memref<2x256xf32, #tpu.memory_space<vmem>>, vector<1x64xf32>,
    %183 = vector.extract_strided_slice %178 {offsets = [2, 0], sizes = [1, 64], strides = [1, 1]} : vector<4x128xf32> to vector<1x64xf32>
    %c0_92 = arith.constant 0 : index
    %c128 = arith.constant 128 : index
    %184 = vector.load %arg27[%c0_92, %c128] : memref<2x256xf32, #tpu.memory_space<vmem>>, vector<1x64xf32>
    tpu.vector_store %arg27[%c0_92, %c128], %183 {strides = array<i32>} : memref<2x256xf32, #tpu.memory_space<vmem>>, vector<1x64xf32>,
    %185 = vector.extract_strided_slice %178 {offsets = [3, 0], sizes = [1, 64], strides = [1, 1]} : vector<4x128xf32> to vector<1x64xf32>
    %c0_93 = arith.constant 0 : index
    %c192 = arith.constant 192 : index
    %186 = vector.load %arg27[%c0_93, %c192] : memref<2x256xf32, #tpu.memory_space<vmem>>, vector<1x64xf32>
    tpu.vector_store %arg27[%c0_93, %c192], %185 {strides = array<i32>} : memref<2x256xf32, #tpu.memory_space<vmem>>, vector<1x64xf32>,
    %187 = vector.extract_strided_slice %178 {offsets = [0, 64], sizes = [1, 64], strides = [1, 1]} : vector<4x128xf32> to vector<1x64xf32>
    %c1_94 = arith.constant 1 : index
    %c0_95 = arith.constant 0 : index
    %188 = vector.load %arg27[%c1_94, %c0_95] : memref<2x256xf32, #tpu.memory_space<vmem>>, vector<1x64xf32>
    tpu.vector_store %arg27[%c1_94, %c0_95], %187 {strides = array<i32>} : memref<2x256xf32, #tpu.memory_space<vmem>>, vector<1x64xf32>,
    %189 = vector.extract_strided_slice %178 {offsets = [1, 64], sizes = [1, 64], strides = [1, 1]} : vector<4x128xf32> to vector<1x64xf32>
    %c1_96 = arith.constant 1 : index
    %c64_97 = arith.constant 64 : index
    %190 = vector.load %arg27[%c1_96, %c64_97] : memref<2x256xf32, #tpu.memory_space<vmem>>, vector<1x64xf32>
    tpu.vector_store %arg27[%c1_96, %c64_97], %189 {strides = array<i32>} : memref<2x256xf32, #tpu.memory_space<vmem>>, vector<1x64xf32>,
    %191 = vector.extract_strided_slice %178 {offsets = [2, 64], sizes = [1, 64], strides = [1, 1]} : vector<4x128xf32> to vector<1x64xf32>
    %c1_98 = arith.constant 1 : index
    %c128_99 = arith.constant 128 : index
    %192 = vector.load %arg27[%c1_98, %c128_99] : memref<2x256xf32, #tpu.memory_space<vmem>>, vector<1x64xf32>
    tpu.vector_store %arg27[%c1_98, %c128_99], %191 {strides = array<i32>} : memref<2x256xf32, #tpu.memory_space<vmem>>, vector<1x64xf32>,
    %193 = vector.extract_strided_slice %178 {offsets = [3, 64], sizes = [1, 64], strides = [1, 1]} : vector<4x128xf32> to vector<1x64xf32>
    %c1_100 = arith.constant 1 : index
    %c192_101 = arith.constant 192 : index
    %194 = vector.load %arg27[%c1_100, %c192_101] : memref<2x256xf32, #tpu.memory_space<vmem>>, vector<1x64xf32>
    tpu.vector_store %arg27[%c1_100, %c192_101], %193 {strides = array<i32>} : memref<2x256xf32, #tpu.memory_space<vmem>>, vector<1x64xf32>,
    %c0_102 = arith.constant 0 : index
    %c0_103 = arith.constant 0 : index
    %195 = vector.load %arg27[%c0_102, %c0_103] : memref<2x256xf32, #tpu.memory_space<vmem>>, vector<2x256xf32>
    %c0_104 = arith.constant 0 : index
    %c0_105 = arith.constant 0 : index
    %196 = vector.load %arg11[%c0_104, %c0_105] : memref<256x16xf32, #tpu.memory_space<vmem>>, vector<256x16xf32>
    %cst_106 = arith.constant dense<0.000000e+00> : vector<2x16xf32>
    %197 = tpu.matmul %195, %196, %cst_106 {dimension_numbers = #tpu.dot_dimension_numbers<[1], [0], [0], [1], [0, 0, 1, 1], [], []>} : vector<2x256xf32>, vector<256x16xf32>, vector<2x16xf32> -> vector<2x16xf32>
    %cst_107 = arith.constant 0.000000e+00 : f32
    %198 = vector.broadcast %cst_107 : f32 to vector<2x16xf32>
    %199 = arith.maximumf %197, %198 : vector<2x16xf32>
    %c0_108 = arith.constant 0 : index
    %c0_109 = arith.constant 0 : index
    %200 = vector.load %arg12[%c0_108, %c0_109] : memref<2x32xf32, #tpu.memory_space<vmem>>, vector<2x32xf32>
    %201 = tpu.concatenate %199, %200 in 1 : vector<2x16xf32>, vector<2x32xf32> -> vector<2x48xf32>
    %c0_110 = arith.constant 0 : index
    %c0_111 = arith.constant 0 : index
    %202 = vector.load %arg13[%c0_110, %c0_111] : memref<48x128xf32, #tpu.memory_space<vmem>>, vector<48x128xf32>
    %cst_112 = arith.constant dense<0.000000e+00> : vector<2x128xf32>
    %203 = tpu.matmul %201, %202, %cst_112 {dimension_numbers = #tpu.dot_dimension_numbers<[1], [0], [0], [1], [0, 0, 1, 1], [], []>} : vector<2x48xf32>, vector<48x128xf32>, vector<2x128xf32> -> vector<2x128xf32>
    %c0_113 = arith.constant 0 : index
    %c0_114 = arith.constant 0 : index
    %204 = vector.load %arg14[%c0_113, %c0_114] : memref<1x128xf32, #tpu.memory_space<vmem>>, vector<1x128xf32>
    %205 = vector.broadcast %204 : vector<1x128xf32> to vector<2x128xf32>
    %206 = arith.addf %203, %205 : vector<2x128xf32>
    %207 = vector.extract_strided_slice %206 {offsets = [0, 0], sizes = [2, 32], strides = [1, 1]} : vector<2x128xf32> to vector<2x32xf32>
    %208 = arith.negf %207 : vector<2x32xf32>
    %209 = math.exp %208 : vector<2x32xf32>
    %cst_115 = arith.constant 1.000000e+00 : f32
    %210 = vector.broadcast %cst_115 : f32 to vector<2x32xf32>
    %211 = arith.addf %210, %209 : vector<2x32xf32>
    %212 = arith.divf %210, %211 : vector<2x32xf32>
    %213 = vector.extract_strided_slice %206 {offsets = [0, 32], sizes = [2, 32], strides = [1, 1]} : vector<2x128xf32> to vector<2x32xf32>
    %214 = arith.negf %213 : vector<2x32xf32>
    %215 = math.exp %214 : vector<2x32xf32>
    %cst_116 = arith.constant 1.000000e+00 : f32
    %216 = vector.broadcast %cst_116 : f32 to vector<2x32xf32>
    %217 = arith.addf %216, %215 : vector<2x32xf32>
    %218 = arith.divf %216, %217 : vector<2x32xf32>
    %219 = vector.extract_strided_slice %206 {offsets = [0, 64], sizes = [2, 32], strides = [1, 1]} : vector<2x128xf32> to vector<2x32xf32>
    %220 = vector.extract_strided_slice %206 {offsets = [0, 96], sizes = [2, 32], strides = [1, 1]} : vector<2x128xf32> to vector<2x32xf32>
    %221 = arith.mulf %212, %220 : vector<2x32xf32>
    %222 = arith.addf %219, %221 : vector<2x32xf32>
    %223 = math.tanh %222 : vector<2x32xf32>
    %cst_117 = arith.constant 1.000000e+00 : f32
    %224 = vector.broadcast %cst_117 : f32 to vector<2x32xf32>
    %225 = arith.subf %224, %218 : vector<2x32xf32>
    %226 = arith.mulf %225, %223 : vector<2x32xf32>
    %227 = arith.mulf %218, %200 : vector<2x32xf32>
    %228 = arith.addf %226, %227 : vector<2x32xf32>
    %c0_118 = arith.constant 0 : index
    %c0_119 = arith.constant 0 : index
    %229 = vector.load %arg24[%c0_118, %c0_119] : memref<2x32xf32, #tpu.memory_space<vmem>>, vector<2x32xf32>
    tpu.vector_store %arg24[%c0_118, %c0_119], %228 {strides = array<i32>} : memref<2x32xf32, #tpu.memory_space<vmem>>, vector<2x32xf32>,
    %c0_120 = arith.constant 0 : index
    %c0_121 = arith.constant 0 : index
    %230 = vector.load %arg15[%c0_120, %c0_121] : memref<32x64xf32, #tpu.memory_space<vmem>>, vector<32x64xf32>
    %cst_122 = arith.constant dense<0.000000e+00> : vector<2x64xf32>
    %231 = tpu.matmul %228, %230, %cst_122 {dimension_numbers = #tpu.dot_dimension_numbers<[1], [0], [0], [1], [0, 0, 1, 1], [], []>} : vector<2x32xf32>, vector<32x64xf32>, vector<2x64xf32> -> vector<2x64xf32>
    %c0_123 = arith.constant 0 : index
    %c0_124 = arith.constant 0 : index
    %232 = vector.load %arg16[%c0_123, %c0_124] : memref<1x64xf32, #tpu.memory_space<vmem>>, vector<1x64xf32>
    %c0_125 = arith.constant 0 : index
    %c0_126 = arith.constant 0 : index
    %233 = vector.load %arg17[%c0_125, %c0_126] : memref<1x64xf32, #tpu.memory_space<vmem>>, vector<1x64xf32>
    %cst_127 = arith.constant dense<0.000000e+00> : vector<64xf32>
    %234 = vector.multi_reduction <add>, %231, %cst_127 [0] : vector<2x64xf32> to vector<64xf32>
    %235 = vector.shape_cast %234 : vector<64xf32> to vector<1x64xf32>
    %cst_128 = arith.constant 2.000000e+00 : f32
    %236 = vector.broadcast %cst_128 : f32 to vector<1x64xf32>
    %237 = arith.divf %235, %236 : vector<1x64xf32>
    %238 = vector.broadcast %237 : vector<1x64xf32> to vector<2x64xf32>
    %239 = arith.subf %231, %238 : vector<2x64xf32>
    %240 = arith.mulf %239, %239 : vector<2x64xf32>
    %cst_129 = arith.constant dense<0.000000e+00> : vector<64xf32>
    %241 = vector.multi_reduction <add>, %240, %cst_129 [0] : vector<2x64xf32> to vector<64xf32>
    %242 = vector.shape_cast %241 : vector<64xf32> to vector<1x64xf32>
    %cst_130 = arith.constant 2.000000e+00 : f32
    %243 = vector.broadcast %cst_130 : f32 to vector<1x64xf32>
    %244 = arith.divf %242, %243 : vector<1x64xf32>
    %245 = vector.broadcast %237 : vector<1x64xf32> to vector<2x64xf32>
    %246 = arith.subf %231, %245 : vector<2x64xf32>
    %cst_131 = arith.constant 9.99999974E-6 : f32
    %247 = vector.broadcast %cst_131 : f32 to vector<1x64xf32>
    %248 = arith.addf %244, %247 : vector<1x64xf32>
    %249 = math.rsqrt %248 : vector<1x64xf32>
    %250 = vector.broadcast %249 : vector<1x64xf32> to vector<2x64xf32>
    %251 = arith.mulf %246, %250 : vector<2x64xf32>
    %252 = vector.broadcast %232 : vector<1x64xf32> to vector<2x64xf32>
    %253 = arith.mulf %251, %252 : vector<2x64xf32>
    %254 = vector.broadcast %233 : vector<1x64xf32> to vector<2x64xf32>
    %255 = arith.addf %253, %254 : vector<2x64xf32>
    %cst_132 = arith.constant 0.000000e+00 : f32
    %256 = vector.broadcast %cst_132 : f32 to vector<2x64xf32>
    %257 = arith.maximumf %255, %256 : vector<2x64xf32>
    %258 = vector.extract_strided_slice %257 {offsets = [0, 0], sizes = [2, 32], strides = [1, 1]} : vector<2x64xf32> to vector<2x32xf32>
    %259 = vector.extract_strided_slice %257 {offsets = [0, 32], sizes = [2, 32], strides = [1, 1]} : vector<2x64xf32> to vector<2x32xf32>
    %c0_133 = arith.constant 0 : index
    %c0_134 = arith.constant 0 : index
    %260 = vector.load %arg18[%c0_133, %c0_134] : memref<32x21xf32, #tpu.memory_space<vmem>>, vector<32x21xf32>
    %cst_135 = arith.constant dense<0.000000e+00> : vector<2x21xf32>
    %261 = tpu.matmul %258, %260, %cst_135 {dimension_numbers = #tpu.dot_dimension_numbers<[1], [0], [0], [1], [0, 0, 1, 1], [], []>} : vector<2x32xf32>, vector<32x21xf32>, vector<2x21xf32> -> vector<2x21xf32>
    %c0_136 = arith.constant 0 : index
    %c0_137 = arith.constant 0 : index
    %262 = vector.load %arg19[%c0_136, %c0_137] : memref<1x21xf32, #tpu.memory_space<vmem>>, vector<1x21xf32>
    %263 = vector.broadcast %262 : vector<1x21xf32> to vector<2x21xf32>
    %264 = arith.addf %261, %263 : vector<2x21xf32>
    %c0_138 = arith.constant 0 : index
    %c0_139 = arith.constant 0 : index
    %265 = vector.load %arg25[%c0_138, %c0_139] : memref<2x21xf32, #tpu.memory_space<vmem>>, vector<2x21xf32>
    tpu.vector_store %arg25[%c0_138, %c0_139], %264 {strides = array<i32>} : memref<2x21xf32, #tpu.memory_space<vmem>>, vector<2x21xf32>,
    %c0_140 = arith.constant 0 : index
    %c0_141 = arith.constant 0 : index
    %266 = vector.load %arg20[%c0_140, %c0_141] : memref<32x256xf32, #tpu.memory_space<vmem>>, vector<32x256xf32>
    %cst_142 = arith.constant dense<0.000000e+00> : vector<2x256xf32>
    %267 = tpu.matmul %259, %266, %cst_142 {dimension_numbers = #tpu.dot_dimension_numbers<[1], [0], [0], [1], [0, 0, 1, 1], [], []>} : vector<2x32xf32>, vector<32x256xf32>, vector<2x256xf32> -> vector<2x256xf32>
    %c0_143 = arith.constant 0 : index
    %c0_144 = arith.constant 0 : index
    %268 = vector.load %arg21[%c0_143, %c0_144] : memref<1x256xf32, #tpu.memory_space<vmem>>, vector<1x256xf32>
    %c0_145 = arith.constant 0 : index
    %c0_146 = arith.constant 0 : index
    %269 = vector.load %arg22[%c0_145, %c0_146] : memref<1x256xf32, #tpu.memory_space<vmem>>, vector<1x256xf32>
    %cst_147 = arith.constant dense<0.000000e+00> : vector<256xf32>
    %270 = vector.multi_reduction <add>, %267, %cst_147 [0] : vector<2x256xf32> to vector<256xf32>
    %271 = vector.shape_cast %270 : vector<256xf32> to vector<1x256xf32>
    %cst_148 = arith.constant 2.000000e+00 : f32
    %272 = vector.broadcast %cst_148 : f32 to vector<1x256xf32>
    %273 = arith.divf %271, %272 : vector<1x256xf32>
    %274 = vector.broadcast %273 : vector<1x256xf32> to vector<2x256xf32>
    %275 = arith.subf %267, %274 : vector<2x256xf32>
    %276 = arith.mulf %275, %275 : vector<2x256xf32>
    %cst_149 = arith.constant dense<0.000000e+00> : vector<256xf32>
    %277 = vector.multi_reduction <add>, %276, %cst_149 [0] : vector<2x256xf32> to vector<256xf32>
    %278 = vector.shape_cast %277 : vector<256xf32> to vector<1x256xf32>
    %cst_150 = arith.constant 2.000000e+00 : f32
    %279 = vector.broadcast %cst_150 : f32 to vector<1x256xf32>
    %280 = arith.divf %278, %279 : vector<1x256xf32>
    %281 = vector.broadcast %273 : vector<1x256xf32> to vector<2x256xf32>
    %282 = arith.subf %267, %281 : vector<2x256xf32>
    %cst_151 = arith.constant 9.99999974E-6 : f32
    %283 = vector.broadcast %cst_151 : f32 to vector<1x256xf32>
    %284 = arith.addf %280, %283 : vector<1x256xf32>
    %285 = math.rsqrt %284 : vector<1x256xf32>
    %286 = vector.broadcast %285 : vector<1x256xf32> to vector<2x256xf32>
    %287 = arith.mulf %282, %286 : vector<2x256xf32>
    %288 = vector.broadcast %268 : vector<1x256xf32> to vector<2x256xf32>
    %289 = arith.mulf %287, %288 : vector<2x256xf32>
    %290 = vector.broadcast %269 : vector<1x256xf32> to vector<2x256xf32>
    %291 = arith.addf %289, %290 : vector<2x256xf32>
    %cst_152 = arith.constant 0.000000e+00 : f32
    %292 = vector.broadcast %cst_152 : f32 to vector<2x256xf32>
    %293 = arith.maximumf %291, %292 : vector<2x256xf32>
    %c0_153 = arith.constant 0 : index
    %c0_154 = arith.constant 0 : index
    %294 = vector.load %arg1[%c0_153, %c0_154] : memref<2x256xf32, #tpu.memory_space<vmem>>, vector<2x256xf32>
    %295 = arith.addf %293, %294 : vector<2x256xf32>
    %c0_155 = arith.constant 0 : index
    %c0_156 = arith.constant 0 : index
    %296 = vector.load %arg23[%c0_155, %c0_156] : memref<2x256xf32, #tpu.memory_space<vmem>>, vector<2x256xf32>
    tpu.vector_store %arg23[%c0_155, %c0_156], %295 {strides = array<i32>} : memref<2x256xf32, #tpu.memory_space<vmem>>, vector<2x256xf32>,
    return
  }
}

</mosaic_0001>

<bundles_post_ra>
// kernel: dynamics_forward.1
= control target key start
LH: loop header
LB: loop body
LE: loop exit
PB: predicated region body
PF: predicated region fallthrough
CT: control target
= control target key end

     0   :  { %s2031_s0 = inlined_call_operand.vmem [shape: f32[6,128], index: 0, kind: input, shape index: {}]   ;;  %s2032_s1 = inlined_call_operand.vmem [shape: f32[2,256], index: 1, kind: input, shape index: {}]   ;;  %s2033_s2 = inlined_call_operand.vmem [shape: f32[9,4,128], index: 2, kind: input, shape index: {}]   ;;  %s2034_s3 = inlined_call_operand.vmem [shape: f32[4,6], index: 3, kind: input, shape index: {}]   ;;  %s2035_s4 = inlined_call_operand.vmem [shape: f32[4,1], index: 4, kind: input, shape index: {}]   ;;  %s2036_s5 = inlined_call_operand.vmem [shape: f32[4,1], index: 5, kind: input, shape index: {}]   ;;  %s2037_s6 = inlined_call_operand.vmem [shape: f32[1,2,4,36], index: 6, kind: input, shape index: {}]   ;;  %s2038_s7 = inlined_call_operand.vmem [shape: f32[1,4,1], index: 7, kind: input, shape index: {}]   ;;  %s2039_s8 = inlined_call_operand.vmem [shape: f32[1,4,1], index: 8, kind: input, shape index: {}]   ;;  %s2040_s9 = inlined_call_operand.vmem [shape: f32[1,4,1], index: 9, kind: input, shape index: {}]   ;;  %s2041_s10 = inlined_call_operand.vmem [shape: f32[1,4,1], index: 10, kind: input, shape index: {}]   ;;  %s2042_s11 = inlined_call_operand.vmem [shape: f32[256,16], index: 11, kind: input, shape index: {}]   ;;  %s2043_s12 = inlined_call_operand.vmem [shape: f32[2,32], index: 12, kind: input, shape index: {}]   ;;  %s2044_s13 = inlined_call_operand.vmem [shape: f32[48,128], index: 13, kind: input, shape index: {}]   ;;  %s2045_s14 = inlined_call_operand.vmem [shape: f32[1,128], index: 14, kind: input, shape index: {}]   ;;  %s2046_s15 = inlined_call_operand.vmem [shape: f32[32,64], index: 15, kind: input, shape index: {}]   ;;  %s2047_s16 = inlined_call_operand.vmem [shape: f32[1,64], index: 16, kind: input, shape index: {}]   ;;  %s2048_s17 = inlined_call_operand.vmem [shape: f32[1,64], index: 17, kind: input, shape index: {}]   ;;  %s2049_s18 = inlined_call_operand.vmem [shape: f32[32,21], index: 18, kind: input, shape index: {}]   ;;  %s2050_s19 = inlined_call_operand.vmem [shape: f32[1,21], index: 19, kind: input, shape index: {}]   ;;  %s2051_s20 = inlined_call_operand.vmem [shape: f32[32,256], index: 20, kind: input, shape index: {}]   ;;  %s2052_s21 = inlined_call_operand.vmem [shape: f32[1,256], index: 21, kind: input, shape index: {}]   ;;  %s2053_s22 = inlined_call_operand.vmem [shape: f32[1,256], index: 22, kind: input, shape index: {}]   ;;  %s2054_s23 = inlined_call_operand.vmem [shape: f32[2,256], index: 23, kind: output, shape index: {0}]   ;;  %s2055_s24 = inlined_call_operand.hbm [shape: f32[2,32], index: 24, kind: output, shape index: {1}]   ;;  %s2056_s25 = inlined_call_operand.hbm [shape: f32[2,21], index: 25, kind: output, shape index: {2}]  }
   0x1   :  { %2060 = sst [smem:[#allocation10_spill]] %s2031_s0 }
   0x2   :  { %2061 = sst [smem:[#allocation11_spill]] %s2032_s1 }
   0x3   :  { %2062 = sst [smem:[#allocation12_spill]] %s2033_s2 }
   0x4   :  { %2063 = sst [smem:[#allocation13_spill]] %s2034_s3 }
   0x5   :  { %2064 = sst [smem:[#allocation14_spill]] %s2035_s4 }
   0x6   :  { %2065 = sst [smem:[#allocation15_spill]] %s2036_s5 }
   0x7   :  { %2066 = sst [smem:[#allocation16_spill]] %s2037_s6 }
   0x8   :  { %2067 = sst [smem:[#allocation17_spill]] %s2038_s7 }
   0x9   :  { %2068 = sst [smem:[#allocation18_spill]] %s2039_s8 }
   0xa   :  { %2069 = sst [smem:[#allocation19_spill]] %s2040_s9 }
   0xb   :  { %31 = vsyncpa [#allocation5], 0  ;;  %s2070_s6 = sld [smem:[#allocation10_spill]]  ;;  %vm93_vm0 = vcmask 1045504   ;;  %vm89_vm1 = vcmask 48128   ;;  %v1498_v1 = vmov 0.0  }
   0xc   :  { %1270 = vmatprep.subr.mxu1 %v1498_v1  ;;  %vm1499_vm2 = vmmov 0   ;;  %s2071_s3 = sld [smem:[#allocation13_spill]] }
   0xd   :  { %1272 = vmatprep.mubr.msk.f32.mxu1 %vm1499_vm2, %v1498_v1 }
  0x11   :  { %v87_v0 = vld [vmem:[%s2070_s6] sm:$0x3f] }
  0x12   :  { %v88_v2 = vld [vmem:[%s2071_s3] sm:$0xf] }
  0x13   :  { %32 = vsyncpa [#allocation7], 0  ;;  %1271 = vmatpush3.msk.msra.mxu1 %vm93_vm0, %v87_v0  ;;  %1298 = vmatprep.mubr.msk.f32.mxu0 %vm1499_vm2, %v1498_v1  ;;  %vm169_vm3 = vcmask 1043456   ;;  %s2072_s8 = sld [smem:[#allocation14_spill]]  ;;  %v1500_v7 = vmov 0   ;;  %s2073_s28 = sld [smem:[#allocation15_spill]] }
  0x14   :  { %1273 = vmatmul.mubr.msk.f32.vlgmr.msra.gmra.mrb[0].mxu1 %vm89_vm1, %v88_v2  ;;  %1430 = vset.pattern.permute.xlu1 %v1500_v7  ;;  %s1501_s9 = smov 8   ;;  %s1502_s5 = smov 9   ;;  %v1505_v25 = vmov 0.0|0.0   ;;  %vm237_vm4 = vcmask 293888   ;;  %vm487_vm5 = vcmask 516096   ;;  %vm502_vm6 = vcmask 1040896  }
  0x15   :  { %1285 = vmatprep.mubr.msk.f32.mxu1 %vm1499_vm2, %v1498_v1  ;;  %1431 = vset.pattern.permute.xlu0 %v1500_v7  ;;  %s1503_s0 = smov 7   ;;  %s2059_s29 = smov 119   ;;  %vm645_vm7 = vcmask 130048   ;;  %vm660_vm8 = vcmask 392192   ;;  %vm772_vm9 = vcmask 261120   ;;  %vm766_vm10 = vcmask 254976  }
  0x16   :  { %1338 = vmatprep.subr.bf16.mxu1 %v1505_v25  ;;  %1344 = vmatprep.subr.bf16.mxu0 %v1505_v25  ;;  %s1506_s2 = smov 1   ;;  %s1507_s6 = smov 127   ;;  %vm847_vm11 = vcmask 517120   ;;  %vm969_vm12 = vcmask 164864  }
  0x17   :  { %s1508_s30 = smov 121   ;;  %s1509_s7 = smov 120  }
  0x18   :  { %s2074_s1 = sld [smem:[#allocation12_spill]]  ;;  %s2075_s27 = sld [smem:[#allocation16_spill]] }
  0x19   :  { %v167_v6 = vld [vmem:[%s2072_s8] sm:$0xf]  ;;  %s2077_s8 = sld [smem:[#allocation17_spill]] }
  0x1a   :  { %186 = vperm.xlu1 %1430, %v167_v6   ;;  %v168_v8 = vld [vmem:[%s2073_s28] sm:$0xf]  ;;  %s2076_s28 = sld [smem:[#allocation18_spill]] }
  0x1e   :  { %192 = vperm.xlu1 %1430, %v168_v8   ;;  %v1692_v26 = vld [vmem:[%s2074_s1 + $0x4] sm:$0xf]  ;;  %v1697_v27 = vld [vmem:[%s2074_s1] sm:$0xf]  ;;  %v1704_v32 = vld [vmem:[%s2074_s1 + $0x8] sm:$0xf] }
  0x1f   :  { %v1709_v33 = vld [vmem:[%s2074_s1 + $0x20] sm:$0xf]  ;;  %v1716_v38 = vld [vmem:[%s2074_s1 + $0xc] sm:$0xf]  ;;  %v1722_v41 = vld [vmem:[%s2074_s1 + $0x14] sm:$0xf] }
  0x20   :  { %v1728_v44 = vld [vmem:[%s2074_s1 + $0x18] sm:$0xf]  ;;  %v85_v47 = vld [vmem:[%s2074_s1 + $0x1c] sm:$0xf]  ;;  %v198_v56 = vld [vmem:[%s2075_s27] sm:$0xf] }
  0x21   :  { %v315_v61 = vld [vmem:[%s2076_s28] sm:$0xf] }
  0x99   :  { %v187_v17 = vpop.permute.xlu1 %186 }
  0x9d   :  { %v193_v21 = vpop.permute.xlu1 %192 }
  0xe7   :  { %v163_v3 = vpop.f32.mrb[0].mxu1 }
  0xe8   :  { %v1274_v4 = vpop.f32.mrb[1].mxu1  ;;  %v170_v5 = vsel %vm169_vm3, %v163_v3, 0.0 }
  0xe9   :  { %171 = vadd.xlane.f32.xlu0 %v170_v5  ;;  %v314_v4 = vld [vmem:[%s2077_s8] sm:$0xf]  ;;  %s1512_s8 = smov 16  }
 0x176   :  { %v172_v9 = vpop.xlane.xlu0 %171 }
 0x177   :  { %v174_v10 = vmul.f32 0.0078125, %v172_v9 }
 0x179   :  { %v175_v11 = vsub.f32 %v163_v3, %v174_v10 }
 0x17b   :  { %v176_v12 = vmul.f32 %v175_v11, %v175_v11 }
 0x17d   :  { %v177_v13 = vsel %vm169_vm3, %v176_v12, 0.0 }
 0x17e   :  { %178 = vadd.xlane.f32.xlu0 %v177_v13 }
 0x20b   :  { %v179_v14 = vpop.xlane.xlu0 %178 }
 0x20c   :  { %v180_v15 = vmul.f32 0.0078125, %v179_v14 }
 0x20e   :  { %v181_v16 = vadd.f32 1e-05, %v180_v15 }
 0x210   :  { %1432 = vrsqrt.f32 %v181_v16 }
 0x21a   :  { %v1433_v18 = vpop.eup %1432 }
 0x21b   :  { %v183_v19 = vmul.f32 %v1433_v18, %v175_v11 }
 0x21d   :  { %v189_v20 = vmul.f32 %v187_v17, %v183_v19 }
 0x21f   :  { %v195_v22 = vadd.f32 %v193_v21, %v189_v20 }
 0x221   :  { %v196_v23 = vadd.f32 %v195_v22, %v87_v0 }
 0x223   :  { %v1668_v24 = vmax.f32 %v196_v23, 0.0 }
 0x225   :  { %215 = vst [vmem:[#allocation2 + $0x10] sm:$0xf] %v1668_v24  ;;  %203 = vrot.lane.b32.xlu1 %v1668_v24, %s1501_s9  ;;  %199 = vrot.lane.b32.xlu0 %v1668_v24, %s1502_s5 }
 0x229   :  { %207 = vrot.lane.b32.xlu1 %v1668_v24, %s1503_s0  ;;  %228 = vrot.lane.b32.xlu0 %v1668_v24, %s2059_s29  ;;  %s2078_s29 = smov 119  }
 0x22d   :  { %211 = vrot.lane.b32.xlu1 %v1668_v24, %s1506_s2 }
 0x231   :  { %216 = vrot.lane.b32.xlu1 %v1668_v24, %s1507_s6 }
 0x235   :  { %220 = vrot.lane.b32.xlu1 %v1668_v24, %s1508_s30 }
 0x239   :  { %224 = vrot.lane.b32.xlu1 %v1668_v24, %s1509_s7 }
 0x297   :  { %v204_v28 = vpop.permute.xlu1 %203  ;;  %v200_v29 = vpop.permute.xlu0 %199 }
 0x298   :  { %v205_v30 = vmul.f32 %v204_v28, %v1692_v26  ;;  %v201_v31 = vmul.f32 %v200_v29, %v1697_v27 }
 0x29a   :  { %206 = vst [vmem:[#allocation2 + $0x4] sm:$0xf] %v205_v30  ;;  %202 = vst [vmem:[#allocation2] sm:$0xf] %v201_v31 }
 0x29b   :  { %v208_v34 = vpop.permute.xlu1 %207  ;;  %v229_v35 = vpop.permute.xlu0 %228 }
 0x29c   :  { %v209_v36 = vmul.f32 %v208_v34, %v1704_v32  ;;  %v230_v37 = vmul.f32 %v229_v35, %v1709_v33 }
 0x29e   :  { %210 = vst [vmem:[#allocation2 + $0x8] sm:$0xf] %v209_v36  ;;  %231 = vst [vmem:[#allocation2 + $0x20] sm:$0xf] %v230_v37 }
 0x29f   :  { %v212_v39 = vpop.permute.xlu1 %211 }
 0x2a0   :  { %v213_v40 = vmul.f32 %v212_v39, %v1716_v38 }
 0x2a1   :  { %v232_v48 = vld [vmem:[#allocation2] sm:$0xff] }
 0x2a2   :  { %214 = vst [vmem:[#allocation2 + $0xc] sm:$0xf] %v213_v40  ;;  %v1189_v40 = vld [vmem:[%s2075_s27 + $0x4] sm:$0xf]  ;;  %s1511_s27 = smov 64  }
 0x2a3   :  { %v217_v42 = vpop.permute.xlu1 %216 }
 0x2a4   :  { %v218_v43 = vmul.f32 %v217_v42, %v1722_v41 }
 0x2a5   :  { %v236_v57 = vld [vmem:[#allocation2 + $0x20] sm:$0xf] }
 0x2a6   :  { %219 = vst [vmem:[#allocation2 + $0x14] sm:$0xf] %v218_v43 }
 0x2a7   :  { %v221_v45 = vpop.permute.xlu1 %220 }
 0x2a8   :  { %v222_v46 = vmul.f32 %v221_v45, %v1728_v44 }
 0x2a9   :  { %v233_v49 = vld [vmem:[#allocation2 + $0x8] sm:$0xff] }
 0x2aa   :  { %223 = vst [vmem:[#allocation2 + $0x18] sm:$0xf] %v222_v46  ;;  %v1339_v50 = vpack.c.bf16 %v233_v49, %v232_v48 }
 0x2ab   :  { %v225_v51 = vpop.permute.xlu1 %224 }
 0x2ac   :  { %v226_v52 = vmul.f32 %v225_v51, %v85_v47  ;;  %1340 = vmatpush3.bf16.msra.mxu1 %v1339_v50  ;;  %v459_v50 = vld [vmem:[%s2041_s10] sm:$0xf] }
 0x2ad   :  { %1341 = vmatprep.subr.bf16.mxu1 %v1505_v25  ;;  %v234_v53 = vld [vmem:[#allocation2 + $0x10] sm:$0xff]  ;;  %v542_v51 = vld [vmem:[%s2042_s11 + $0x80] sm:$0xff] }
 0x2ae   :  { %227 = vst [vmem:[#allocation2 + $0x1c] sm:$0xf] %v226_v52  ;;  %v543_v52 = vld [vmem:[%s2042_s11 + $0x88] sm:$0xff] }
 0x2b5   :  { %v235_v54 = vld [vmem:[#allocation2 + $0x18] sm:$0xff] }
 0x2b6   :  { %v1342_v55 = vpack.c.bf16 %v235_v54, %v234_v53  ;;  %v526_v53 = vld [vmem:[%s2042_s11] sm:$0xff]  ;;  %v1350_v54 = vpack.c.bf16 %v543_v52, %v542_v51  ;;  %v541_v51 = vld [vmem:[%s2042_s11 + $0x78] sm:$0xff] }
 0x2b8   :  { %1343 = vmatpush3.bf16.msra.mxu1 %v1342_v55  ;;  %v527_v55 = vld [vmem:[%s2042_s11 + $0x8] sm:$0xff] }
 0x2b9   :  { %1283 = vmatprep.subr.mxu1 %v1498_v1 }
 0x2bc   :  { %1284 = vmatpush3.msk.msra.mxu1 %vm169_vm3, %v236_v57  ;;  %v545_v57 = vld [vmem:[%s2042_s11 + $0x98] sm:$0xff] }
 0x2bd   :  { %1286 = vmatmul.mubr.msk.f32.vlgmr.msra.gmra.mrb[2].mxu1 %vm237_vm4, %v198_v56  ;;  %v544_v56 = vld [vmem:[%s2042_s11 + $0x90] sm:$0xff]  ;;  %1351 = vmatprep.subr.bf16.mxu1 %v1350_v54 }
 0x390   :  { %v310_v58 = vpop.f32.mrb[2].mxu1 }
 0x391   :  { %v1287_v59 = vpop.f32.mrb[3].mxu1  ;;  %v316_v60 = vsel %vm169_vm3, %v310_v58, 0.0 }
 0x392   :  { %317 = vadd.xlane.f32.xlu1 %v316_v60  ;;  %v1354_v59 = vpack.c.bf16 %v545_v57, %v544_v56  ;;  %v528_v60 = vld [vmem:[%s2042_s11 + $0x10] sm:$0xff] }
 0x3a3   :  { %337 = vperm.xlu1 %1430, %v315_v61   ;;  %v529_v61 = vld [vmem:[%s2042_s11 + $0x18] sm:$0xff] }
 0x41f   :  { %v318_v62 = vpop.xlane.xlu1 %317 }
 0x420   :  { %v319_v63 = vmul.f32 0.0078125, %v318_v62  ;;  %v546_v62 = vld [vmem:[%s2042_s11 + $0xa0] sm:$0xff] }
 0x422   :  { %v320_v0 = vsub.f32 %v310_v58, %v319_v63  ;;  %v1352_v58 = vpack.c.bf16 %v527_v55, %v526_v53  ;;  %v547_v63 = vld [vmem:[%s2042_s11 + $0xa8] sm:$0xff] }
 0x423   :  { %v338_v12 = vpop.permute.xlu1 %337 }
 0x424   :  { %v321_v2 = vmul.f32 %v320_v0, %v320_v0  ;;  %1353 = vmatpush3.bf16.msra.mxu1 %v1352_v58 }
 0x425   :  { %1355 = vmatprep.subr.bf16.mxu1 %v1354_v59 }
 0x426   :  { %v322_v3 = vsel %vm169_vm3, %v321_v2, 0.0  ;;  %v1358_v2 = vpack.c.bf16 %v547_v63, %v546_v62  ;;  %v640_v62 = vld [vmem:[%s2043_s12] sm:$0x3] }
 0x427   :  { %323 = vadd.xlane.f32.xlu0 %v322_v3  ;;  %v530_v3 = vld [vmem:[%s2042_s11 + $0x20] sm:$0xff] }
 0x43d   :  { %331 = vperm.xlu0 %1431, %v314_v4   ;;  %v531_v4 = vld [vmem:[%s2042_s11 + $0x28] sm:$0xff] }
 0x4b4   :  { %v324_v5 = vpop.xlane.xlu0 %323 }
 0x4b5   :  { %v325_v6 = vmul.f32 0.0078125, %v324_v5  ;;  %v548_v5 = vld [vmem:[%s2042_s11 + $0xb0] sm:$0xff] }
 0x4b7   :  { %v326_v7 = vadd.f32 1e-05, %v325_v6  ;;  %v549_v6 = vld [vmem:[%s2042_s11 + $0xb8] sm:$0xff] }
 0x4b9   :  { %1434 = vrsqrt.f32 %v326_v7  ;;  %v1360_v7 = vpack.c.bf16 %v531_v4, %v530_v3 }
 0x4bc   :  { %v332_v9 = vpop.permute.xlu0 %331 }
 0x4c3   :  { %v1435_v8 = vpop.eup %1434 }
 0x4c4   :  { %v328_v10 = vmul.f32 %v1435_v8, %v320_v0  ;;  %v1356_v0 = vpack.c.bf16 %v529_v61, %v528_v60  ;;  %v1362_v8 = vpack.c.bf16 %v549_v6, %v548_v5  ;;  %v647_v60 = vld [vmem:[%s2044_s13] sm:$0xff]  ;;  %v648_v61 = vld [vmem:[%s2044_s13 + $0x8] sm:$0xff] }
 0x4c5   :  { %v1383_v63 = vpack.c.bf16 %v648_v61, %v647_v60 }
 0x4c6   :  { %v334_v11 = vmul.f32 %v332_v9, %v328_v10  ;;  %1357 = vmatpush3.bf16.msra.mxu1 %v1356_v0  ;;  %v532_v9 = vld [vmem:[%s2042_s11 + $0x30] sm:$0xff]  ;;  %v533_v10 = vld [vmem:[%s2042_s11 + $0x38] sm:$0xff] }
 0x4c7   :  { %1359 = vmatprep.subr.bf16.mxu1 %v1358_v2 }
 0x4c8   :  { %v340_v13 = vadd.f32 %v338_v12, %v334_v11  ;;  %v1364_v11 = vpack.c.bf16 %v533_v10, %v532_v9  ;;  %v651_v10 = vld [vmem:[%s2044_s13 + $0x20] sm:$0xff] }
 0x4ca   :  { %v341_v14 = vmax.f32 %v340_v13, 0.0  ;;  %1361 = vmatpush3.bf16.msra.mxu1 %v1360_v7  ;;  %v649_v7 = vld [vmem:[%s2044_s13 + $0x10] sm:$0xff] }
 0x4cb   :  { %1363 = vmatprep.subr.bf16.mxu1 %v1362_v8  ;;  %v650_v8 = vld [vmem:[%s2044_s13 + $0x18] sm:$0xff] }
 0x4cc   :  { %360 = vst [vmem:[#allocation2 + $0x10] sm:$0xf] %v341_v14  ;;  %369 = vrot.lane.b32.xlu0 %v341_v14, %s1509_s7  ;;  %344 = vrot.lane.b32.xlu1 %v341_v14, %s1502_s5  ;;  %v1386_v9 = vpack.c.bf16 %v650_v8, %v649_v7 }
 0x4ce   :  { %1365 = vmatpush3.bf16.msra.mxu1 %v1364_v11  ;;  %v652_v11 = vld [vmem:[%s2044_s13 + $0x28] sm:$0xff]  ;;  %s1513_s13 = smov 32  }
 0x4d0   :  { %348 = vrot.lane.b32.xlu1 %v341_v14, %s1501_s9 }
 0x4d4   :  { %352 = vrot.lane.b32.xlu1 %v341_v14, %s1503_s0 }
 0x4d8   :  { %356 = vrot.lane.b32.xlu1 %v341_v14, %s1506_s2  ;;  %s1516_s2 = smov [#allocation6]  }
 0x4dc   :  { %361 = vrot.lane.b32.xlu1 %v341_v14, %s1507_s6  ;;  %s2079_s6 = sld [smem:[#allocation19_spill]] }
 0x4e0   :  { %365 = vrot.lane.b32.xlu1 %v341_v14, %s1508_s30 }
 0x4e4   :  { %373 = vrot.lane.b32.xlu1 %v341_v14, %s2078_s29 }
 0x53e   :  { %v370_v15 = vpop.permute.xlu0 %369  ;;  %v345_v16 = vpop.permute.xlu1 %344 }
 0x53f   :  { %v371_v17 = vmul.f32 %v370_v15, %v85_v47  ;;  %v346_v18 = vmul.f32 %v345_v16, %v1697_v27  ;;  %v550_v15 = vld [vmem:[%s2042_s11 + $0xc0] sm:$0xff]  ;;  %v551_v16 = vld [vmem:[%s2042_s11 + $0xc8] sm:$0xff] }
 0x541   :  { %372 = vst [vmem:[#allocation2 + $0x1c] sm:$0xf] %v371_v17  ;;  %347 = vst [vmem:[#allocation2] sm:$0xf] %v346_v18  ;;  %v1510_v17 = vmov 1983009808  }
 0x542   :  { %v349_v19 = vpop.permute.xlu1 %348  ;;  %v491_v18 = vunpack.c.l.s4 %v1510_v17 }
 0x543   :  { %v350_v20 = vmul.f32 %v349_v19, %v1692_v26  ;;  %v493_v19 = vlaneseq }
 0x545   :  { %351 = vst [vmem:[#allocation2 + $0x4] sm:$0xf] %v350_v20  ;;  %v1366_v20 = vpack.c.bf16 %v551_v16, %v550_v15 }
 0x546   :  { %v353_v21 = vpop.permute.xlu1 %352 }
 0x547   :  { %v354_v22 = vmul.f32 %v353_v21, %v1704_v32  ;;  %v534_v21 = vld [vmem:[%s2042_s11 + $0x40] sm:$0xff]  ;;  %1367 = vmatprep.subr.bf16.mxu1 %v1366_v20 }
 0x549   :  { %355 = vst [vmem:[#allocation2 + $0x8] sm:$0xf] %v354_v22  ;;  %v535_v22 = vld [vmem:[%s2042_s11 + $0x48] sm:$0xff] }
 0x54a   :  { %v357_v23 = vpop.permute.xlu1 %356 }
 0x54b   :  { %v358_v28 = vmul.f32 %v357_v23, %v1716_v38 }
 0x54c   :  { %v377_v34 = vld [vmem:[#allocation2] sm:$0xff] }
 0x54d   :  { %359 = vst [vmem:[#allocation2 + $0xc] sm:$0xf] %v358_v28  ;;  %v1368_v28 = vpack.c.bf16 %v535_v22, %v534_v21 }
 0x54e   :  { %v362_v29 = vpop.permute.xlu1 %361 }
 0x54f   :  { %v363_v30 = vmul.f32 %v362_v29, %v1722_v41  ;;  %1369 = vmatpush3.bf16.msra.mxu1 %v1368_v28 }
 0x551   :  { %364 = vst [vmem:[#allocation2 + $0x14] sm:$0xf] %v363_v30 }
 0x552   :  { %v366_v31 = vpop.permute.xlu1 %365 }
 0x553   :  { %v367_v27 = vmul.f32 %v366_v31, %v1728_v44  ;;  %v458_v44 = vld [vmem:[%s2079_s6] sm:$0xf]  ;;  %v552_v31 = vld [vmem:[%s2042_s11 + $0xd0] sm:$0xff]  ;;  %s1171_s6 = sshll.u32 %s1516_s2, 4  ;;  %s1172_s6 = int_to_ptr.vmem [resolvable:$true] %s1171_s6 }
 0x554   :  { %v378_v35 = vld [vmem:[#allocation2 + $0x8] sm:$0xff] }
 0x555   :  { %368 = vst [vmem:[#allocation2 + $0x18] sm:$0xf] %v367_v27  ;;  %v1345_v26 = vpack.c.bf16 %v378_v35, %v377_v34  ;;  %v553_v27 = vld [vmem:[%s2042_s11 + $0xd8] sm:$0xff]  ;;  %v492_v35 = vunpack.c.0.s8 %v491_v18 }
 0x556   :  { %v374_v36 = vpop.permute.xlu1 %373 }
 0x557   :  { %v375_v37 = vmul.f32 %v374_v36, %v1709_v33  ;;  %1346 = vmatpush3.bf16.msra.mxu0 %v1345_v26  ;;  %v1848_v26 = vshrl.u32 %v493_v19, 7  ;;  %v1370_v36 = vpack.c.bf16 %v553_v27, %v552_v31  ;;  %v1193_v19 = vld [vmem:[%s2045_s14] ss:$0 sm:$0xff] }
 0x558   :  { %1347 = vmatprep.subr.bf16.mxu0 %v1505_v25  ;;  %v379_v32 = vld [vmem:[#allocation2 + $0x10] sm:$0xff] }
 0x559   :  { %376 = vst [vmem:[#allocation2 + $0x20] sm:$0xf] %v375_v37  ;;  %v536_v37 = vld [vmem:[%s2042_s11 + $0x50] sm:$0xff]  ;;  %1371 = vmatprep.subr.bf16.mxu1 %v1370_v36  ;;  %v768_v36 = vld [vmem:[%s2046_s15] sm:$0xff] }
 0x55c   :  { %v380_v38 = vld [vmem:[#allocation2 + $0x18] sm:$0xff] }
 0x55d   :  { %v1348_v39 = vpack.c.bf16 %v380_v38, %v379_v32  ;;  %v537_v32 = vld [vmem:[%s2042_s11 + $0x58] sm:$0xff] }
 0x55f   :  { %1349 = vmatpush3.bf16.msra.mxu0 %v1348_v39  ;;  %v1372_v39 = vpack.c.bf16 %v537_v32, %v536_v37  ;;  %v769_v37 = vld [vmem:[%s2046_s15 + $0x8] sm:$0xff]  ;;  %v770_v32 = vld [vmem:[%s2046_s15 + $0x10] sm:$0xff] }
 0x560   :  { %1296 = vmatprep.subr.mxu0 %v1498_v1  ;;  %v381_v41 = vld [vmem:[#allocation2 + $0x20] sm:$0xf] }
 0x561   :  { %1373 = vmatpush3.bf16.msra.mxu1 %v1372_v39  ;;  %v771_v39 = vld [vmem:[%s2046_s15 + $0x18] sm:$0xff] }
 0x563   :  { %1297 = vmatpush3.msk.msra.mxu0 %vm169_vm3, %v381_v41  ;;  %v554_v41 = vld [vmem:[%s2042_s11 + $0xe0] sm:$0xff] }
 0x564   :  { %1299 = vmatmul.mubr.msk.f32.vlgmr.msra.gmra.mrb[0].mxu0 %vm237_vm4, %v1189_v40  ;;  %1382 = vmatprep.subr.bf16.mxu0 %v1505_v25 }
 0x565   :  { %1313 = vmatprep.mubr.msk.f32.mxu0 %vm1499_vm2, %v1498_v1  ;;  %1384 = vmatpush3.bf16.msra.mxu0 %v1383_v63 }
 0x566   :  { %1385 = vmatprep.subr.bf16.mxu0 %v1505_v25 }
 0x569   :  { %1387 = vmatpush3.bf16.msra.mxu0 %v1386_v9 }
 0x56a   :  { %1388 = vmatprep.subr.bf16.mxu0 %v1505_v25 }
 0x637   :  { %v454_v33 = vpop.f32.mrb[0].mxu0 }
 0x638   :  { %v1300_v42 = vpop.f32.mrb[1].mxu0  ;;  %v460_v43 = vsel %vm169_vm3, %v454_v33, 0.0 }
 0x639   :  { %461 = vadd.xlane.f32.xlu0 %v460_v43  ;;  %v538_v42 = vld [vmem:[%s2042_s11 + $0x60] sm:$0xff] }
 0x64f   :  { %475 = vperm.xlu0 %1431, %v458_v44   ;;  %v495_v44 = vsub.s32 %v492_v35, %v1848_v26 }
 0x6c6   :  { %v462_v45 = vpop.xlane.xlu0 %461 }
 0x6c7   :  { %v463_v46 = vmul.f32 0.0078125, %v462_v45 }
 0x6c9   :  { %v464_v47 = vsub.f32 %v454_v33, %v463_v46  ;;  %v555_v33 = vld [vmem:[%s2042_s11 + $0xe8] sm:$0xff] }
 0x6ca   :  { %v1374_v45 = vpack.c.bf16 %v555_v33, %v554_v41  ;;  %v539_v46 = vld [vmem:[%s2042_s11 + $0x68] sm:$0xff] }
 0x6cb   :  { %v465_v48 = vmul.f32 %v464_v47, %v464_v47 }
 0x6cc   :  { %1375 = vmatprep.subr.bf16.mxu1 %v1374_v45 }
 0x6cd   :  { %v466_v49 = vsel %vm169_vm3, %v465_v48, 0.0  ;;  %v557_v48 = vld [vmem:[%s2042_s11 + $0xf8] sm:$0xff] }
 0x6ce   :  { %467 = vadd.xlane.f32.xlu1 %v466_v49  ;;  %v476_v30 = vpop.permute.xlu0 %475  ;;  %v1376_v49 = vpack.c.bf16 %v539_v46, %v538_v42 }
 0x6d0   :  { %1377 = vmatpush3.bf16.msra.mxu1 %v1376_v49  ;;  %v886_v49 = vld [vmem:[%s2049_s18 + $0x8] sm:$0xff] }
 0x6df   :  { %481 = vperm.xlu1 %1430, %v459_v50  }
 0x75b   :  { %v468_v12 = vpop.xlane.xlu1 %467 }
 0x75c   :  { %v469_v13 = vmul.f32 0.0078125, %v468_v12  ;;  %v1389_v12 = vpack.c.bf16 %v652_v11, %v651_v10 }
 0x75e   :  { %v470_v14 = vadd.f32 1e-05, %v469_v13  ;;  %1390 = vmatpush3.bf16.msra.mxu0 %v1389_v12 }
 0x75f   :  { %v482_v38 = vpop.permute.xlu1 %481  ;;  %1391 = vmatprep.subr.bf16.mxu0 %v1505_v25 }
 0x760   :  { %1436 = vrsqrt.f32 %v470_v14 }
 0x76a   :  { %v1437_v23 = vpop.eup %1436 }
 0x76b   :  { %v472_v29 = vmul.f32 %v1437_v23, %v464_v47  ;;  %v556_v47 = vld [vmem:[%s2042_s11 + $0xf0] sm:$0xff] }
 0x76c   :  { %v1378_v50 = vpack.c.bf16 %v557_v48, %v556_v47  ;;  %v885_v48 = vld [vmem:[%s2049_s18] sm:$0xff] }
 0x76d   :  { %v478_v34 = vmul.f32 %v476_v30, %v472_v29 }
 0x76e   :  { %1379 = vmatprep.subr.bf16.mxu1 %v1378_v50  ;;  %v1398_v50 = vpack.c.bf16 %v886_v49, %v885_v48 }
 0x76f   :  { %v484_v40 = vadd.f32 %v482_v38, %v478_v34  ;;  %v1392_v38 = vpack.c.bf16 %v769_v37, %v768_v36 }
 0x771   :  { %v485_v43 = vadd.f32 %v484_v40, %v1668_v24  ;;  %v540_v24 = vld [vmem:[%s2042_s11 + $0x70] sm:$0xff]  ;;  %v1395_v40 = vpack.c.bf16 %v771_v39, %v770_v32 }
 0x772   :  { %v1380_v53 = vpack.c.bf16 %v541_v51, %v540_v24  ;;  %v887_v24 = vld [vmem:[%s2049_s18 + $0x10] sm:$0xff]  ;;  %v888_v51 = vld [vmem:[%s2049_s18 + $0x18] sm:$0xff] }
 0x773   :  { %v486_v52 = vmax.f32 %v485_v43, 0.0 }
 0x774   :  { %1381 = vmatpush3.bf16.msra.mxu1 %v1380_v53  ;;  %v972_v53 = vld [vmem:[%s2051_s20 + $0x8] sm:$0xff] }
 0x775   :  { %v496_v54 = vrot.slane %v486_v52, %v495_v44  ;;  %488 = vst.msk [vmem:[#allocation3] sm:$0x1] %vm487_vm5, %v486_v52  ;;  %v1401_v52 = vpack.c.bf16 %v888_v51, %v887_v24 }
 0x777   :  { %513 = vrot.lane.b32.xlu0 %v496_v54, %s1511_s27  ;;  %v504_v55 = vcombine.high %v496_v54, %v496_v54  ;;  %v497_v56 = vrot.slane %v496_v54, 7  ;;  %v974_v54 = vld [vmem:[%s2051_s20 + $0x18] sm:$0xff] }
 0x779   :  { %519 = vrot.lane.b32.xlu1 %v504_v55, %s1511_s27  ;;  %v498_v57 = vrot.slane %v497_v56, 2  ;;  %v507_v58 = vrot.slane %v504_v55, 7  ;;  %506 = vst.msk [vmem:[#allocation3 + $0x2] sm:$0x1] %vm487_vm5, %v504_v55  ;;  %v1403_v55 = vpack.c.bf16 %v974_v54, %v972_v53 }
 0x77b   :  { %499 = vrot.lane.b32.xlu0 %v498_v57, %s1511_s27  ;;  %v508_v59 = vrot.slane %v507_v58, 2 }
 0x77d   :  { %509 = vrot.lane.b32.xlu1 %v508_v59, %s1511_s27 }
 0x77f   :  { %642 = vrot.lane.b32.xlu0 %v640_v62, %s1512_s8 }
 0x7e9   :  { %v514_v0 = vpop.permute.xlu0 %513 }
 0x7ea   :  { %516 = vst.msk [vmem:[#allocation3 + $0x1] sm:$0x1] %vm487_vm5, %v514_v0 }
 0x7eb   :  { %518 = vst.msk [vmem:[#allocation3 + $0x1] sm:$0x1] %vm502_vm6, %v498_v57  ;;  %v520_v2 = vpop.permute.xlu1 %519 }
 0x7ec   :  { %522 = vst.msk [vmem:[#allocation3 + $0x3] sm:$0x1] %vm487_vm5, %v520_v2 }
 0x7ed   :  { %524 = vst.msk [vmem:[#allocation3 + $0x3] sm:$0x1] %vm502_vm6, %v508_v59  ;;  %v500_v3 = vpop.permute.xlu0 %499 }
 0x7ee   :  { %503 = vst.msk [vmem:[#allocation3] sm:$0x1] %vm502_vm6, %v500_v3 }
 0x7ef   :  { %v510_v4 = vpop.permute.xlu1 %509 }
 0x7f0   :  { %512 = vst.msk [vmem:[#allocation3 + $0x2] sm:$0x1] %vm502_vm6, %v510_v4 }
 0x7f1   :  { %v643_v16 = vpop.permute.xlu0 %642 }
 0x7f7   :  { %v1192_v5 = vld.sshfl [vmem:[#allocation3] sm:$0x33 pattern:$0x76325410] }
 0x7f8   :  { %v566_v6 = vcombine.high %v1192_v5, %v1192_v5 }
 0x7fa   :  { %633 = vmatprep.mubr.f32.mxu1 %v566_v6 }
 0x7fb   :  { %634 = vmatmul.mubr.f32.vlgmr.msra.gmra.mrb[4].mxu1 %v1192_v5 }
 0x8ce   :  { %v1250_v13 = vpop.f32.mrb[4].mxu1 }
 0x8cf   :  { %v1251_v14 = vpop.f32.mrb[5].mxu1 }
 0x8d0   :  { %v1252_v15 = vadd.f32 %v1251_v14, %v1250_v13  ;;  %v1197_v14 = vld [vmem:[%s2047_s16] ss:$0 sm:$0xff] }
 0x8d2   :  { %v639_v17 = vmax.f32 %v1252_v15, 0.0 }
 0x8d4   :  { %v646_v18 = vsel %vm645_vm7, %v639_v17, %v643_v16  ;;  %v1198_v16 = vld [vmem:[%s2048_s17] ss:$0 sm:$0xff] }
 0x8d5   :  { %1314 = vmatmul.mubr.msk.f32.vlgmr.msra.gmra.mrb[2].mxu0 %vm660_vm8, %v646_v18  ;;  %v971_v18 = vld [vmem:[%s2051_s20] sm:$0xff] }
 0x8d6   :  { %1324 = vmatprep.mubr.msk.f32.mxu0 %vm1499_vm2, %v1498_v1  ;;  %1393 = vmatpush3.bf16.msra.mxu0 %v1392_v38 }
 0x8d7   :  { %1394 = vmatprep.subr.bf16.mxu0 %v1505_v25 }
 0x8da   :  { %1396 = vmatpush3.bf16.msra.mxu0 %v1395_v40 }
 0x8db   :  { %1397 = vmatprep.subr.bf16.mxu0 %v1505_v25 }
 0x9a8   :  { %v730_v20 = vpop.f32.mrb[2].mxu0 }
 0x9a9   :  { %v731_v21 = vadd.f32 %v1193_v19, %v730_v20  ;;  %v1315_v22 = vpop.f32.mrb[3].mxu0  ;;  %v973_v19 = vld [vmem:[%s2051_s20 + $0x10] sm:$0xff]  ;;  %v976_v20 = vld [vmem:[%s2051_s20 + $0x28] sm:$0xff] }
 0x9ab   :  { %741 = vrot.lane.b32.xlu1 %v731_v21, %s1513_s13  ;;  %v1195_v23 = vmul.f32 -1.442695, %v731_v21 }
 0x9ad   :  { %1438 = vpow2.f32 %v1195_v23  ;;  %v1405_v23 = vpack.c.bf16 %v973_v19, %v971_v18 }
 0x9b7   :  { %v1439_v28 = vpop.eup %1438 }
 0x9b8   :  { %v737_v29 = vadd.f32 1.0, %v1439_v28 }
 0x9ba   :  { %1440 = vrcp.f32 %v737_v29 }
 0x9c4   :  { %v1441_v30 = vpop.eup %1440 }
 0x9c5   :  { %v751_v42 = vsub.f32 1.0, %v1441_v30 }
 0xa1d   :  { %v742_v31 = vpop.permute.xlu1 %741 }
 0xa1e   :  { %v744_v27 = vmul.f32 %v1441_v30, %v742_v31  ;;  %v977_v31 = vld [vmem:[%s2051_s20 + $0x30] sm:$0xff] }
 0xa20   :  { %746 = vrot.lane.b32.xlu0 %v744_v27, %s1511_s27  ;;  %s1514_s27 = smov 96  }
 0xa24   :  { %757 = vrot.lane.b32.xlu0 %v640_v62, %s1513_s13 }
 0xa92   :  { %v747_v34 = vpop.permute.xlu0 %746 }
 0xa93   :  { %v749_v35 = vadd.f32 %v747_v34, %v731_v21  ;;  %v978_v21 = vld [vmem:[%s2051_s20 + $0x38] sm:$0xff] }
 0xa94   :  { %v1407_v29 = vpack.c.bf16 %v978_v21, %v976_v20 }
 0xa95   :  { %1442 = vtanh.f32 %v749_v35  ;;  %v1199_v35 = vld [vmem:[%s2050_s19] ss:$0 sm:$0xff] }
 0xa96   :  { %v758_v33 = vpop.permute.xlu0 %757 }
 0xa97   :  { %v760_v44 = vmul.f32 %v1441_v30, %v758_v33  ;;  %v975_v30 = vld [vmem:[%s2051_s20 + $0x20] sm:$0xff]  ;;  %s1515_s20 = smov [#allocation4]  }
 0xa98   :  { %v1409_v27 = vpack.c.bf16 %v977_v31, %v975_v30 }
 0xa9f   :  { %v1443_v41 = vpop.eup %1442 }
 0xaa0   :  { %753 = vrot.lane.b32.xlu1 %v1443_v41, %s1514_s27 }
 0xb12   :  { %v754_v43 = vpop.permute.xlu1 %753 }
 0xb13   :  { %v756_v45 = vmul.f32 %v754_v43, %v751_v42 }
 0xb15   :  { %v761_v46 = vadd.f32 %v760_v44, %v756_v45 }
 0xb17   :  { %763 = vrot.lane.b32.xlu1 %v761_v46, %s1514_s27 }
 0xb89   :  { %v764_v47 = vpop.permute.xlu1 %763 }
 0xb8a   :  { %1325 = vmatmul.mubr.msk.f32.vlgmr.msra.gmra.mrb[4].mxu0 %vm772_vm9, %v764_v47  ;;  %767 = vst.msk [vmem:[#allocation4] sm:$0x3] %vm766_vm10, %v764_v47 }
 0xb8b   :  { %1335 = vmatprep.mubr.msk.f32.mxu0 %vm1499_vm2, %v1498_v1  ;;  %1399 = vmatpush3.bf16.msra.mxu0 %v1398_v50 }
 0xb8c   :  { %1400 = vmatprep.subr.bf16.mxu0 %v1505_v25 }
 0xb8f   :  { %1402 = vmatpush3.bf16.msra.mxu0 %v1401_v52 }
 0xb90   :  { %1404 = vmatprep.subr.bf16.mxu0 %v1403_v55 }
 0xc5d   :  { %v841_v25 = vpop.f32.mrb[4].mxu0 }
 0xc5e   :  { %v848_v56 = vsel %vm847_vm11, %v841_v25, 0.0  ;;  %v1326_v57 = vpop.f32.mrb[5].mxu0 }
 0xc5f   :  { %v849_v58 = vrot.slane %v848_v56, 4 }
 0xc61   :  { %v850_v59 = vadd.f32 %v849_v58, %v848_v56 }
 0xc63   :  { %v851_v60 = vrot.slane %v850_v59, 2 }
 0xc65   :  { %v852_v61 = vadd.f32 %v851_v60, %v850_v59 }
 0xc67   :  { %v853_v62 = vrot.slane %v852_v61, 1 }
 0xc69   :  { %v854_v63 = vadd.f32 %v853_v62, %v852_v61 }
 0xc6b   :  { %v856_v0 = vmul.f32 0.5, %v854_v63 }
 0xc6d   :  { %v857_v2 = vsub.f32 %v841_v25, %v856_v0 }
 0xc6f   :  { %v858_v3 = vmul.f32 %v857_v2, %v857_v2 }
 0xc71   :  { %v859_v4 = vsel %vm847_vm11, %v858_v3, 0.0 }
 0xc72   :  { %v860_v5 = vrot.slane %v859_v4, 4 }
 0xc74   :  { %v861_v6 = vadd.f32 %v860_v5, %v859_v4 }
 0xc76   :  { %v862_v7 = vrot.slane %v861_v6, 2 }
 0xc78   :  { %v863_v8 = vadd.f32 %v862_v7, %v861_v6 }
 0xc7a   :  { %v864_v9 = vrot.slane %v863_v8, 1 }
 0xc7c   :  { %v865_v10 = vadd.f32 %v864_v9, %v863_v8 }
 0xc7e   :  { %v866_v11 = vmul.f32 0.5, %v865_v10 }
 0xc80   :  { %v867_v12 = vadd.f32 1e-05, %v866_v11 }
 0xc82   :  { %1444 = vrsqrt.f32 %v867_v12 }
 0xc8c   :  { %v1445_v13 = vpop.eup %1444 }
 0xc8d   :  { %v869_v15 = vmul.f32 %v1445_v13, %v857_v2 }
 0xc8f   :  { %v876_v17 = vmul.f32 %v1197_v14, %v869_v15 }
 0xc91   :  { %v883_v22 = vadd.f32 %v1198_v16, %v876_v17 }
 0xc93   :  { %v884_v28 = vmax.f32 %v883_v22, 0.0 }
 0xc95   :  { %979 = vrot.lane.b32.xlu0 %v884_v28, %s1514_s27  ;;  %1336 = vmatmul.mubr.msk.f32.vlgmr.msra.gmra.mrb[6].mxu0 %vm772_vm9, %v884_v28  ;;  %s1161_s27 = sshll.u32 %s1515_s20, 4  ;;  %s1162_s27 = int_to_ptr.vmem [resolvable:$true] %s1161_s27 }
 0xc96   :  { %1406 = vmatpush1.bf16.msra.mxu0 %v1405_v23  ;;  %1047 = vmatprep.mubr.f32.mxu0 %v1498_v1  ;;  %s1450_s30 = scalar_lea.vmem %s1162_s27, 32  ;;  %p1455_p1 = scmp.lt.s32.totalorder %s1162_s27, %s1162_s27 }
 0xc97   :  { %1408 = vmatprep.subr.bf16.mxu0 %v1407_v29  ;;  %p1451_p0 = scmp.ne.s32.totalorder %s1162_s27, %s1450_s30  ;;  %p1456_p2 = scmp.lt.s32.totalorder %s1450_s30, %s1450_s30 }
 0xc99   :  { %p1457_p3 = por %p1456_p2, %p1455_p1 }
 0xc9a   :  { %1410 = vmatpush1.bf16.msra.mxu0 %v1409_v27 }
 0xc9b   :  { %p1458_p4 = pnand %p1457_p3, %p1451_p0 }
 0xd07   :  { %v980_v34 = vpop.permute.xlu0 %979 }
 0xd08   :  { %1201 = vmatmul.mubr.msk.f32.vlgmr.msra.gmra.mrb[8].mxu0 %vm772_vm9, %v980_v34 }
 0xd68   :  { %v965_v36 = vpop.f32.mrb[6].mxu0 }
 0xd69   :  { %v966_v37 = vadd.f32 %v1199_v35, %v965_v36  ;;  %v1337_v32 = vpop.f32.mrb[7].mxu0 }
 0xd6b   :  { %970 = vst.msk [vmem:[#allocation6] sm:$0x3] %vm969_vm12, %v966_v37 }
 0xd6c   :  { %1461 = shalt.err (!%p1458_p4)
}
 0xd6d   :  { %s1462_s13 = scalar_lea.hbm %s2055_s24, 32 }
 0xd6e   :  { %p1463_p5 = scmp.ne.s32.totalorder %s2055_s24, %s1462_s13  ;;  %p1466_p6 = scmp.lt.u32.totalorder %s1462_s13, %s2055_s24 }
 0xd70   :  { %p1468_p7 = pnand %p1466_p6, %p1463_p5 }
 0xd72   :  { %1471 = shalt.err (!%p1468_p7)
}
 0xd73   :  { %1164 = dma.vmem_to_hbm [thread:$0]  %s1162_s27, 32, %s2055_s24, [#allocation5]  }
 0xd74   :  { %s1472_s3 = scalar_lea.vmem %s1172_s6, 32  ;;  %p1477_p9 = scmp.lt.s32.totalorder %s1172_s6, %s1172_s6 }
 0xd75   :  { %p1473_p8 = scmp.ne.s32.totalorder %s1172_s6, %s1472_s3  ;;  %p1478_p10 = scmp.lt.s32.totalorder %s1472_s3, %s1472_s3 }
 0xd77   :  { %p1479_p11 = por %p1478_p10, %p1477_p9 }
 0xd79   :  { %p1480_p12 = pnand %p1479_p11, %p1473_p8 }
 0xd7b   :  { %1483 = shalt.err (!%p1480_p12)
}
 0xd7c   :  { %s1484_s15 = scalar_lea.hbm %s2056_s25, 32 }
 0xd7d   :  { %p1485_p13 = scmp.ne.s32.totalorder %s2056_s25, %s1484_s15  ;;  %p1488_p0 = scmp.lt.u32.totalorder %s1484_s15, %s2056_s25 }
 0xd7f   :  { %p1490_p1 = pnand %p1488_p0, %p1485_p13 }
 0xd81   :  { %1493 = shalt.err (!%p1490_p1)
}
 0xd82   :  { %1174 = dma.vmem_to_hbm [thread:$0]  %s1172_s6, 32, %s2056_s25, [#allocation7]   ;;  %vm1056_vm13 = vcmask 1041408   ;;  %v1102_v11 = vsub.s32 0, %v1848_v26  ;;  %v1054_v12 = vld [vmem:[%s2052_s21] sm:$0x3] }
 0xd83   :  { %v1106_v13 = vsub.s32 1, %v1848_v26  ;;  %v1055_v14 = vld [vmem:[%s2053_s22] sm:$0x3]  ;;  %s2080_s2 = sld [smem:[#allocation11_spill]] }
 0xd84   :  { %v1103_v15 = vrot.slane %v1054_v12, %v1102_v11  ;;  %v1116_v20 = vrot.slane %v1055_v14, %v1102_v11 }
 0xd85   :  { %v1107_v17 = vrot.slane %v1054_v12, %v1106_v13  ;;  %v1120_v22 = vrot.slane %v1055_v14, %v1106_v13 }
 0xd89   :  { %v1202_v28 = vld.sshfl [vmem:[%s2080_s2] sm:$0x33 pattern:$0x76325410] }
 0xd8a   :  { %v1136_v31 = vcombine.high %v1202_v28, %v1202_v28 }
 0xddb   :  { %v1049_v1 = vpop.f32.mrb[8].mxu0 }
 0xddc   :  { %v1057_v38 = vsel %vm1056_vm13, %v1049_v1, 0.0  ;;  %v1051_v39 = vpop.f32.mrb[9].mxu0 }
 0xddd   :  { %v1058_v40 = vrot.slane %v1057_v38, 4  ;;  %v1064_v41 = vsel %vm1056_vm13, %v1051_v39, 0.0 }
 0xdde   :  { %v1065_v33 = vrot.slane %v1064_v41, 4 }
 0xddf   :  { %v1059_v42 = vadd.f32 %v1058_v40, %v1057_v38 }
 0xde0   :  { %v1066_v43 = vadd.f32 %v1065_v33, %v1064_v41 }
 0xde1   :  { %v1060_v44 = vrot.slane %v1059_v42, 2 }
 0xde2   :  { %v1067_v45 = vrot.slane %v1066_v43, 2 }
 0xde3   :  { %v1061_v46 = vadd.f32 %v1060_v44, %v1059_v42 }
 0xde4   :  { %v1068_v47 = vadd.f32 %v1067_v45, %v1066_v43 }
 0xde5   :  { %v1062_v48 = vrot.slane %v1061_v46, 1 }
 0xde6   :  { %v1069_v49 = vrot.slane %v1068_v47, 1 }
 0xde7   :  { %v1063_v50 = vadd.f32 %v1062_v48, %v1061_v46 }
 0xde8   :  { %v1070_v24 = vadd.f32 %v1069_v49, %v1068_v47 }
 0xde9   :  { %v1071_v51 = vmul.f32 0.5, %v1063_v50 }
 0xdea   :  { %v1072_v52 = vmul.f32 0.5, %v1070_v24 }
 0xdeb   :  { %v1073_v53 = vsub.f32 %v1049_v1, %v1071_v51 }
 0xdec   :  { %v1074_v54 = vsub.f32 %v1051_v39, %v1072_v52 }
 0xded   :  { %v1075_v55 = vmul.f32 %v1073_v53, %v1073_v53 }
 0xdee   :  { %v1076_v25 = vmul.f32 %v1074_v54, %v1074_v54 }
 0xdef   :  { %v1077_v56 = vsel %vm1056_vm13, %v1075_v55, 0.0 }
 0xdf0   :  { %v1078_v57 = vrot.slane %v1077_v56, 4  ;;  %v1084_v58 = vsel %vm1056_vm13, %v1076_v25, 0.0 }
 0xdf1   :  { %v1085_v59 = vrot.slane %v1084_v58, 4 }
 0xdf2   :  { %v1079_v60 = vadd.f32 %v1078_v57, %v1077_v56 }
 0xdf3   :  { %v1086_v61 = vadd.f32 %v1085_v59, %v1084_v58 }
 0xdf4   :  { %v1080_v62 = vrot.slane %v1079_v60, 2 }
 0xdf5   :  { %v1087_v63 = vrot.slane %v1086_v61, 2 }
 0xdf6   :  { %v1081_v0 = vadd.f32 %v1080_v62, %v1079_v60 }
 0xdf7   :  { %v1088_v2 = vadd.f32 %v1087_v63, %v1086_v61 }
 0xdf8   :  { %v1082_v3 = vrot.slane %v1081_v0, 1 }
 0xdf9   :  { %v1089_v4 = vrot.slane %v1088_v2, 1 }
 0xdfa   :  { %v1083_v5 = vadd.f32 %v1082_v3, %v1081_v0 }
 0xdfb   :  { %v1090_v6 = vadd.f32 %v1089_v4, %v1088_v2 }
 0xdfc   :  { %v1091_v7 = vmul.f32 0.5, %v1083_v5 }
 0xdfd   :  { %v1092_v8 = vmul.f32 0.5, %v1090_v6 }
 0xdfe   :  { %v1093_v9 = vadd.f32 1e-05, %v1091_v7 }
 0xdff   :  { %v1094_v10 = vadd.f32 1e-05, %v1092_v8 }
 0xe00   :  { %1446 = vrsqrt.f32 %v1093_v9 }
 0xe01   :  { %1448 = vrsqrt.f32 %v1094_v10 }
 0xe0a   :  { %v1447_v16 = vpop.eup %1446 }
 0xe0b   :  { %v1449_v18 = vpop.eup %1448  ;;  %v1097_v19 = vmul.f32 %v1447_v16, %v1073_v53 }
 0xe0c   :  { %v1098_v21 = vmul.f32 %v1449_v18, %v1074_v54 }
 0xe0d   :  { %v1110_v23 = vmul.f32 %v1103_v15, %v1097_v19 }
 0xe0e   :  { %v1111_v29 = vmul.f32 %v1107_v17, %v1098_v21 }
 0xe0f   :  { %v1123_v30 = vadd.f32 %v1116_v20, %v1110_v23 }
 0xe10   :  { %v1124_v26 = vadd.f32 %v1120_v22, %v1111_v29 }
 0xe11   :  { %v1125_v27 = vmax.f32 %v1123_v30, 0.0 }
 0xe12   :  { %v1126_v34 = vmax.f32 %v1124_v26, 0.0 }
 0xe13   :  { %v1139_v35 = vadd.f32 %v1202_v28, %v1125_v27 }
 0xe14   :  { %v1140_v36 = vadd.f32 %v1136_v31, %v1126_v34 }
 0xe16   :  { %v1143_v37 = vcombine.low %v1139_v35, %v1140_v36 }
 0xe18   :  { %1203 = vst.sshfl [vmem:[%s2054_s23] sm:$0x33 pattern:$0x76325410] %v1143_v37 }
 0xe19   :  { %1494 = dma.done.wait [#allocation5], 32  }
 0xe1a   :  { %1495 = vsyncadd [#allocation5], 4294967264 }
 0xe1b   :  { %1496 = dma.done.wait [#allocation7], 32  }
 0xe1c   :  { %1497 = vsyncadd [#allocation7], 4294967264 }
 0xe1d   :  { %1183 = vsyncpa [#allocation5], 1 }
 0xe1e   :  { %1184 = vsyncpa [#allocation7], 1 }

</bundles_post_ra>
